<compile_context>
chip_gen: v7x
topology: tpu7x:2x2x1
jax: 0.10.0
libtpu: 0.0.40
codegen_flags: <defaults>
</compile_context>

<pallas_src>
import jax
import jax.numpy as jnp
from jax import lax
from jax.experimental import pallas as pl
from jax.experimental.pallas import tpu as pltpu

BN_EPS = 1e-5
MXU_DTYPE = jnp.bfloat16   # MXU-native input dtype; accumulation stays f32
ACT_DTYPE = jnp.bfloat16   # inter-pass intermediates (y1, y2) in HBM
LANES = 128


def _round_up(x, m):
    return (x + m - 1) // m * m


def _vmem_limit_bytes():
    """Generation-aware VMEM limit: ~3/4 of physical capacity, capped at 64 MiB.
    (v7x: 64 MiB physical -> 48 MiB; v5e/v6e: 128 MiB physical -> 64 MiB)."""
    try:
        cap = int(pltpu.get_tpu_info().vmem_capacity_bytes)
    except Exception:
        cap = 128 * 1024 * 1024
    return max(32 * 1024 * 1024, min(cap * 3 // 4, 64 * 1024 * 1024))


# ----------------------------- in-kernel helpers ----------------------------

def _write_halo_slab(slab_ref, act):
    """Write act (Hp, Wp, C) bf16 into slab_ref (Hp+2, Wp, 3*C).

    The three W-shifted copies of the zero-padded activation are packed along the lane
    axis (K-packing over dx):   slab[y, x, dx*C + c] == pad1(act)[y, x + dx, c].
    Only the two halo rows are explicitly zeroed; the W-edge zero columns are built into
    the interior value, so no persistent-scratch assumption is needed.
    """
    Hp, Wp, C = act.shape
    zrow = jnp.zeros((1, Wp, 3 * C), act.dtype)
    slab_ref[pl.ds(0, 1), :, :] = zrow                   # top halo row
    slab_ref[pl.ds(Hp + 1, 1), :, :] = zrow              # bottom halo row
    zcol = jnp.zeros((Hp, 1, C), act.dtype)
    interior = jnp.concatenate(
        [jnp.concatenate([zcol, act[:, :Wp - 1, :]], axis=1),    # dx = 0
         act,                                                     # dx = 1
         jnp.concatenate([act[:, 1:, :], zcol], axis=1)],         # dx = 2
        axis=2)
    slab_ref[pl.ds(1, Hp), :, :] = interior               # single tile-aligned store


def _conv3x3_packed(slab_ref, w_ref, Cp):
    """3x3 conv as 3 accumulating MXU matmuls with K = 3*C (dx folded into K)."""
    Hp = slab_ref.shape[0] - 2
    Wp = slab_ref.shape[1]
    C3 = slab_ref.shape[2]
    HW = Hp * Wp
    acc = jnp.zeros((HW, Cp), jnp.float32)
    for dy in range(3):
        lhs = slab_ref[pl.ds(dy, Hp), :, :].reshape(HW, C3)   # aligned leading-dim read
        acc = acc + jnp.dot(lhs, w_ref[dy], preferred_element_type=jnp.float32)
    return acc


def _store_stats(st_ref, acc):
    """Per-image partial BN statistics: two direct row stores (no concat)."""
    st_ref[0, 0:1, :] = jnp.sum(acc, axis=0, keepdims=True)
    st_ref[0, 1:2, :] = jnp.sum(acc * acc, axis=0, keepdims=True)


# ----------------------------- Pallas kernels ------------------------------

def _pool_conv_stats_kernel(x_ref, w_ref, y_ref, st_ref, slab_ref):
    """Fused 2x2 maxpool + 3x3 conv1 (K-packed MXU matmuls) + BN1 partial stats."""
    C = slab_ref.shape[2] // 3
    Cp = y_ref.shape[2]

    # ---- 2x2 / stride-2 max pool (VPU), then ONE cast to bf16 ----
    # x block layout: (1, Hp, 2, Wp, 2*Cin) -- H pair on dim 2, W pair folded onto the
    # lane axis as [w_even channels | w_odd channels].
    xb = x_ref[0]
    m = jnp.maximum(xb[:, 0], xb[:, 1])                              # pool over H pair
    pooled = jnp.maximum(m[:, :, :C], m[:, :, C:]).astype(MXU_DTYPE)  # (Hp, Wp, C)

    _write_halo_slab(slab_ref, pooled)
    acc = _conv3x3_packed(slab_ref, w_ref, Cp)

    y_ref[0] = acc.astype(y_ref.dtype)
    _store_stats(st_ref, acc)


def _bn_relu_conv_stats_kernel(y1_ref, sc_ref, sh_ref, w_ref,
                               y2_ref, st_ref, slab_ref):
    """BN1 (folded scale/shift FMA) + ReLU + 3x3 conv2 (K-packed) + BN2 partial stats."""
    Hp = slab_ref.shape[0] - 2
    Wp = slab_ref.shape[1]
    C = slab_ref.shape[2] // 3
    Cp = y2_ref.shape[2]

    # BN folded into one FMA (f32), ReLU, then ONE cast to bf16
    h = jnp.maximum(y1_ref[0].astype(jnp.float32) * sc_ref[...] + sh_ref[...], 0.0)
    hb = h.astype(MXU_DTYPE).reshape(Hp, Wp, C)

    _write_halo_slab(slab_ref, hb)
    acc = _conv3x3_packed(slab_ref, w_ref, Cp)

    y2_ref[0] = acc.astype(y2_ref.dtype)
    _store_stats(st_ref, acc)


def _bn_relu_kernel(y_ref, sc_ref, sh_ref, o_ref):
    """Final BN2 (folded) + ReLU; only the Cout real channels are written to HBM."""
    Cout = o_ref.shape[2]
    act = jnp.maximum(y_ref[0].astype(jnp.float32) * sc_ref[...] + sh_ref[...], 0.0)
    o_ref[0] = act[:, :Cout]


# ------------------------------ wrapper glue --------------------------------

def _bn_scale_shift(stats_part, gamma_p, beta_p, n_rows):
    """Combine per-image partial stats -> folded BN scale/shift. Tiny (Cp,)-sized math;
    padded channels have gamma=0 so they map to exactly zero (no NaNs)."""
    s = jnp.sum(stats_part, axis=0)                        # (2, Cp)
    mean = s[0] / n_rows
    var = jnp.maximum(s[1] / n_rows - mean * mean, 0.0)    # one-pass, f32 accumulation
    scale = gamma_p[0] * lax.rsqrt(var + BN_EPS)
    shift = beta_p[0] - mean * scale
    return scale.reshape(1, -1), shift.reshape(1, -1)


def contracter_forward(x_nchw, params):
    """Forward pass of Contracter. Input/output are NCHW float32."""
    # conv biases b1/b2 kept for interface parity; exactly cancelled by BN mean subtraction.
    w1, b1, g1, be1, w2, b2, g2, be2 = params
    N, Cin, H, W = x_nchw.shape
    assert H % 2 == 0 and W % 2 == 0  # TODO(synk): floor-pooling for odd H/W like PyTorch
    Hp, Wp = H // 2, W // 2
    HW = Hp * Wp
    Cout = w1.shape[0]
    Cp = _round_up(Cout, LANES)      # lane-dense channel dimension
    R = N * HW                       # true BN row count (no padded rows)

    # ----- layout glue (1x traffic): NCHW -> NHWC, fold 2x2 pool phases -----
    x_nhwc = jnp.transpose(x_nchw, (0, 2, 3, 1))
    x_r = x_nhwc.reshape(N, Hp, 2, Wp, 2 * Cin)   # pure row-major reshape

    def prep_w(w, cin, cin_p):
        # OIHW -> (3, 3*cin_p, Cp) with row index dy-major: [dy, dx*cin_p + c, o],
        # zero-padded channels, bf16 for the MXU (matches the K-packed slab layout).
        wt = jnp.transpose(w, (2, 3, 1, 0))                           # (kh, kw, ci, co)
        wt = jnp.pad(wt, ((0, 0), (0, 0), (0, cin_p - cin), (0, Cp - Cout)))
        return wt.reshape(3, 3 * cin_p, Cp).astype(MXU_DTYPE)

    w1p = prep_w(w1, Cin, Cin)       # (3, 3*Cin, Cp)
    w2p = prep_w(w2, Cout, Cp)       # (3, 3*Cp,  Cp)

    def pad_c(v):                    # (Cout,) -> (1, Cp), zeros in padded lanes
        return jnp.pad(v, (0, Cp - Cout)).reshape(1, Cp)

    g1p, be1p = pad_c(g1), pad_c(be1)
    g2p, be2p = pad_c(g2), pad_c(be2)

    cparams = pltpu.CompilerParams(
        dimension_semantics=("parallel",),
        vmem_limit_bytes=_vmem_limit_bytes(),
    )
    # TODO(synk): for large images add a spatial row-band grid axis (1-row halo) so the
    # per-step VMEM footprint stays bounded on v7x (64 MiB physical).

    # ----- pass 1: fused maxpool + conv1 + BN1 partial stats -----
    y1, st1 = pl.pallas_call(
        _pool_conv_stats_kernel,
        grid=(N,),
        in_specs=[
            pl.BlockSpec((1, Hp, 2, Wp, 2 * Cin), lambda i: (i, 0, 0, 0, 0)),
            pl.BlockSpec((3, 3 * Cin, Cp), lambda i: (0, 0, 0)),
        ],
        out_specs=[
            pl.BlockSpec((1, HW, Cp), lambda i: (i, 0, 0)),
            pl.BlockSpec((1, 2, Cp), lambda i: (i, 0, 0)),
        ],
        out_shape=[
            jax.ShapeDtypeStruct((N, HW, Cp), ACT_DTYPE),
            jax.ShapeDtypeStruct((N, 2, Cp), jnp.float32),
        ],
        scratch_shapes=[pltpu.VMEM((Hp + 2, Wp, 3 * Cin), MXU_DTYPE)],
        compiler_params=cparams,
    )(x_r, w1p)

    sc1, sh1 = _bn_scale_shift(st1, g1p, be1p, R)

    # ----- pass 2: BN1 + ReLU + conv2 + BN2 partial stats -----
    y2, st2 = pl.pallas_call(
        _bn_relu_conv_stats_kernel,
        grid=(N,),
        in_specs=[
            pl.BlockSpec((1, HW, Cp), lambda i: (i, 0, 0)),
            pl.BlockSpec((1, Cp), lambda i: (0, 0)),
            pl.BlockSpec((1, Cp), lambda i: (0, 0)),
            pl.BlockSpec((3, 3 * Cp, Cp), lambda i: (0, 0, 0)),
        ],
        out_specs=[
            pl.BlockSpec((1, HW, Cp), lambda i: (i, 0, 0)),
            pl.BlockSpec((1, 2, Cp), lambda i: (i, 0, 0)),
        ],
        out_shape=[
            jax.ShapeDtypeStruct((N, HW, Cp), ACT_DTYPE),
            jax.ShapeDtypeStruct((N, 2, Cp), jnp.float32),
        ],
        scratch_shapes=[pltpu.VMEM((Hp + 2, Wp, 3 * Cp), MXU_DTYPE)],
        compiler_params=cparams,
    )(y1, sc1, sh1, w2p)

    sc2, sh2 = _bn_scale_shift(st2, g2p, be2p, R)

    # ----- pass 3: BN2 + ReLU (Cout-only output, no padded channels in HBM) -----
    out = pl.pallas_call(
        _bn_relu_kernel,
        grid=(N,),
        in_specs=[
            pl.BlockSpec((1, HW, Cp), lambda i: (i, 0, 0)),
            pl.BlockSpec((1, Cp), lambda i: (0, 0)),
            pl.BlockSpec((1, Cp), lambda i: (0, 0)),
        ],
        out_specs=pl.BlockSpec((1, HW, Cout), lambda i: (i, 0, 0)),
        out_shape=jax.ShapeDtypeStruct((N, HW, Cout), jnp.float32),
        compiler_params=cparams,
    )(y2, sc2, sh2)

    out = out.reshape(N, Hp, Wp, Cout)
    return jnp.transpose(out, (0, 3, 1, 2))          # back to NCHW (Cout-only tensor)


# ------------------------- pure-JAX reference check -------------------------

def reference_forward(x, params):
    w1, b1, g1, be1, w2, b2, g2, be2 = params
    N, C, H, W = x.shape
    xp = x.reshape(N, C, H // 2, 2, W // 2, 2).max(axis=(3, 5))

    def conv_bn_relu(h, w, b, g, be):
        y = lax.conv_general_dilated(h, w, (1, 1), ((1, 1), (1, 1)),
                                     dimension_numbers=("NCHW", "OIHW", "NCHW"))
        y = y + b[None, :, None, None]
        mu = y.mean(axis=(0, 2, 3), keepdims=True)
        var = ((y - mu) ** 2).mean(axis=(0, 2, 3), keepdims=True)
        y = (y - mu) / jnp.sqrt(var + BN_EPS)
        y = y * g[None, :, None, None] + be[None, :, None, None]
        return jnp.maximum(y, 0.0)

    h = conv_bn_relu(xp, w1, b1, g1, be1)
    return conv_bn_relu(h, w2, b2, g2, be2)


# ----------------------------------- main -----------------------------------

if __name__ == "__main__":
    N, Cin, Cout, H, W = 2, 4, 8, 16, 16
    ks = jax.random.split(jax.random.PRNGKey(0), 9)

    x = jax.random.normal(ks[0], (N, Cin, H, W), jnp.float32)
    # Deterministic synthetic parameters (PyTorch shapes: OIHW conv weights).
    w1 = 0.1 * jax.random.normal(ks[1], (Cout, Cin, 3, 3), jnp.float32)
    b1 = 0.1 * jax.random.normal(ks[2], (Cout,), jnp.float32)
    g1 = 1.0 + 0.1 * jax.random.normal(ks[3], (Cout,), jnp.float32)
    be1 = 0.1 * jax.random.normal(ks[4], (Cout,), jnp.float32)
    w2 = 0.1 * jax.random.normal(ks[5], (Cout, Cout, 3, 3), jnp.float32)
    b2 = 0.1 * jax.random.normal(ks[6], (Cout,), jnp.float32)
    g2 = 1.0 + 0.1 * jax.random.normal(ks[7], (Cout,), jnp.float32)
    be2 = 0.1 * jax.random.normal(ks[8], (Cout,), jnp.float32)
    params = (w1, b1, g1, be1, w2, b2, g2, be2)

    fwd = jax.jit(contracter_forward)
    out = jax.block_until_ready(fwd(x, params))
    assert out.shape == (N, Cout, H // 2, W // 2), out.shape

    ref = reference_forward(x, params)
    max_err = float(jnp.max(jnp.abs(out - ref)))
    # bf16 MXU inputs and bf16 inter-pass intermediates (f32 accumulation/stats) vs. a
    # pure-f32 reference; BN amplifies the relative error to ~bf16 precision level.
    if not bool(jnp.allclose(out, ref, atol=5e-2, rtol=5e-2)):
        raise AssertionError(f"Pallas output mismatch, max abs err = {max_err}")

    print("KERNEL_OK")
</pallas_src>

<mosaic_0001>
module attributes {stable_mosaic.version = 11 : i64} {
  func.func @_pool_conv_stats_kernel(%arg0: i32, %arg1: memref<1x8x2x8x8xf32, #tpu.memory_space<vmem>>, %arg2: memref<3x12x128xbf16, #tpu.memory_space<vmem>>, %arg3: memref<1x64x128xbf16, #tpu.memory_space<vmem>>, %arg4: memref<1x2x128xf32, #tpu.memory_space<vmem>>, %arg5: memref<10x8x12xbf16, #tpu.memory_space<vmem>>) attributes {dimension_semantics = [#tpu.dimension_semantics<parallel>], iteration_bounds = array<i64: 2>, scalar_prefetch = 0 : i64, scratch_operands = 1 : i64, tpu.core_type = #tpu.core_type<tc>, window_params = [{transform_indices = @transform_0, window_bounds = array<i64: 1, 8, 2, 8, 8>}, {pipeline_mode = #tpu.pipeline_mode<synchronous>, transform_indices = @transform_1, window_bounds = array<i64: 3, 12, 128>}, {transform_indices = @transform_2, window_bounds = array<i64: 1, 64, 128>}, {transform_indices = @transform_3, window_bounds = array<i64: 1, 2, 128>}]} {
    %c0 = arith.constant 0 : index
    %c0_0 = arith.constant 0 : index
    %c0_1 = arith.constant 0 : index
    %c0_2 = arith.constant 0 : index
    %c0_3 = arith.constant 0 : index
    %0 = vector.load %arg1[%c0, %c0_0, %c0_1, %c0_2, %c0_3] : memref<1x8x2x8x8xf32, #tpu.memory_space<vmem>>, vector<1x8x2x8x8xf32>
    %1 = vector.shape_cast %0 : vector<1x8x2x8x8xf32> to vector<8x2x8x8xf32>
    %2 = vector.extract_strided_slice %1 {offsets = [0, 0, 0, 0], sizes = [8, 1, 8, 8], strides = [1, 1, 1, 1]} : vector<8x2x8x8xf32> to vector<8x1x8x8xf32>
    %3 = vector.shape_cast %2 : vector<8x1x8x8xf32> to vector<8x8x8xf32>
    %4 = vector.extract_strided_slice %1 {offsets = [0, 1, 0, 0], sizes = [8, 1, 8, 8], strides = [1, 1, 1, 1]} : vector<8x2x8x8xf32> to vector<8x1x8x8xf32>
    %5 = vector.shape_cast %4 : vector<8x1x8x8xf32> to vector<8x8x8xf32>
    %6 = arith.maximumf %3, %5 : vector<8x8x8xf32>
    %7 = vector.extract_strided_slice %6 {offsets = [0, 0, 0], sizes = [8, 8, 4], strides = [1, 1, 1]} : vector<8x8x8xf32> to vector<8x8x4xf32>
    %8 = vector.extract_strided_slice %6 {offsets = [0, 0, 4], sizes = [8, 8, 4], strides = [1, 1, 1]} : vector<8x8x8xf32> to vector<8x8x4xf32>
    %9 = arith.maximumf %7, %8 : vector<8x8x4xf32>
    %10 = arith.truncf %9 : vector<8x8x4xf32> to vector<8x8x4xbf16>
    %cst = arith.constant 0.000000e+00 : bf16
    %11 = vector.broadcast %cst : bf16 to vector<1x8x12xbf16>
    %c0_4 = arith.constant 0 : index
    %c0_5 = arith.constant 0 : index
    %c0_6 = arith.constant 0 : index
    %12 = vector.load %arg5[%c0_4, %c0_5, %c0_6] : memref<10x8x12xbf16, #tpu.memory_space<vmem>>, vector<1x8x12xbf16>
    tpu.vector_store %arg5[%c0_4, %c0_5, %c0_6], %11 {strides = array<i32>} : memref<10x8x12xbf16, #tpu.memory_space<vmem>>, vector<1x8x12xbf16>,
    %c9 = arith.constant 9 : index
    %c0_7 = arith.constant 0 : index
    %c0_8 = arith.constant 0 : index
    %13 = vector.load %arg5[%c9, %c0_7, %c0_8] : memref<10x8x12xbf16, #tpu.memory_space<vmem>>, vector<1x8x12xbf16>
    tpu.vector_store %arg5[%c9, %c0_7, %c0_8], %11 {strides = array<i32>} : memref<10x8x12xbf16, #tpu.memory_space<vmem>>, vector<1x8x12xbf16>,
    %cst_9 = arith.constant 0.000000e+00 : bf16
    %14 = vector.broadcast %cst_9 : bf16 to vector<8x1x4xbf16>
    %15 = vector.extract_strided_slice %10 {offsets = [0, 0, 0], sizes = [8, 7, 4], strides = [1, 1, 1]} : vector<8x8x4xbf16> to vector<8x7x4xbf16>
    %16 = tpu.concatenate %14, %15 in 1 : vector<8x1x4xbf16>, vector<8x7x4xbf16> -> vector<8x8x4xbf16>
    %17 = vector.extract_strided_slice %10 {offsets = [0, 1, 0], sizes = [8, 7, 4], strides = [1, 1, 1]} : vector<8x8x4xbf16> to vector<8x7x4xbf16>
    %18 = tpu.concatenate %17, %14 in 1 : vector<8x7x4xbf16>, vector<8x1x4xbf16> -> vector<8x8x4xbf16>
    %19 = tpu.concatenate %16, %10, %18 in 2 : vector<8x8x4xbf16>, vector<8x8x4xbf16>, vector<8x8x4xbf16> -> vector<8x8x12xbf16>
    %c1 = arith.constant 1 : index
    %c0_10 = arith.constant 0 : index
    %c0_11 = arith.constant 0 : index
    %20 = vector.load %arg5[%c1, %c0_10, %c0_11] : memref<10x8x12xbf16, #tpu.memory_space<vmem>>, vector<8x8x12xbf16>
    tpu.vector_store %arg5[%c1, %c0_10, %c0_11], %19 {strides = array<i32>} : memref<10x8x12xbf16, #tpu.memory_space<vmem>>, vector<8x8x12xbf16>,
    %cst_12 = arith.constant 0.000000e+00 : f32
    %21 = vector.broadcast %cst_12 : f32 to vector<64x128xf32>
    %c0_13 = arith.constant 0 : index
    %c0_14 = arith.constant 0 : index
    %c0_15 = arith.constant 0 : index
    %22 = vector.load %arg5[%c0_13, %c0_14, %c0_15] : memref<10x8x12xbf16, #tpu.memory_space<vmem>>, vector<8x8x12xbf16>
    %23 = vector.shape_cast %22 : vector<8x8x12xbf16> to vector<64x12xbf16>
    %c0_16 = arith.constant 0 : index
    %c0_17 = arith.constant 0 : index
    %c0_18 = arith.constant 0 : index
    %24 = vector.load %arg2[%c0_16, %c0_17, %c0_18] : memref<3x12x128xbf16, #tpu.memory_space<vmem>>, vector<1x12x128xbf16>
    %25 = vector.shape_cast %24 : vector<1x12x128xbf16> to vector<12x128xbf16>
    %cst_19 = arith.constant dense<0.000000e+00> : vector<64x128xf32>
    %26 = tpu.matmul %23, %25, %cst_19 {dimension_numbers = #tpu.dot_dimension_numbers<[1], [0], [0], [1], [0, 0, 1, 1], [], []>} : vector<64x12xbf16>, vector<12x128xbf16>, vector<64x128xf32> -> vector<64x128xf32>
    %27 = arith.addf %21, %26 : vector<64x128xf32>
    %c1_20 = arith.constant 1 : index
    %c0_21 = arith.constant 0 : index
    %c0_22 = arith.constant 0 : index
    %28 = vector.load %arg5[%c1_20, %c0_21, %c0_22] : memref<10x8x12xbf16, #tpu.memory_space<vmem>>, vector<8x8x12xbf16>
    %29 = vector.shape_cast %28 : vector<8x8x12xbf16> to vector<64x12xbf16>
    %c1_23 = arith.constant 1 : index
    %c0_24 = arith.constant 0 : index
    %c0_25 = arith.constant 0 : index
    %30 = vector.load %arg2[%c1_23, %c0_24, %c0_25] : memref<3x12x128xbf16, #tpu.memory_space<vmem>>, vector<1x12x128xbf16>
    %31 = vector.shape_cast %30 : vector<1x12x128xbf16> to vector<12x128xbf16>
    %cst_26 = arith.constant dense<0.000000e+00> : vector<64x128xf32>
    %32 = tpu.matmul %29, %31, %cst_26 {dimension_numbers = #tpu.dot_dimension_numbers<[1], [0], [0], [1], [0, 0, 1, 1], [], []>} : vector<64x12xbf16>, vector<12x128xbf16>, vector<64x128xf32> -> vector<64x128xf32>
    %33 = arith.addf %27, %32 : vector<64x128xf32>
    %c2 = arith.constant 2 : index
    %c0_27 = arith.constant 0 : index
    %c0_28 = arith.constant 0 : index
    %34 = vector.load %arg5[%c2, %c0_27, %c0_28] : memref<10x8x12xbf16, #tpu.memory_space<vmem>>, vector<8x8x12xbf16>
    %35 = vector.shape_cast %34 : vector<8x8x12xbf16> to vector<64x12xbf16>
    %c2_29 = arith.constant 2 : index
    %c0_30 = arith.constant 0 : index
    %c0_31 = arith.constant 0 : index
    %36 = vector.load %arg2[%c2_29, %c0_30, %c0_31] : memref<3x12x128xbf16, #tpu.memory_space<vmem>>, vector<1x12x128xbf16>
    %37 = vector.shape_cast %36 : vector<1x12x128xbf16> to vector<12x128xbf16>
    %cst_32 = arith.constant dense<0.000000e+00> : vector<64x128xf32>
    %38 = tpu.matmul %35, %37, %cst_32 {dimension_numbers = #tpu.dot_dimension_numbers<[1], [0], [0], [1], [0, 0, 1, 1], [], []>} : vector<64x12xbf16>, vector<12x128xbf16>, vector<64x128xf32> -> vector<64x128xf32>
    %39 = arith.addf %33, %38 : vector<64x128xf32>
    %40 = arith.truncf %39 : vector<64x128xf32> to vector<64x128xbf16>
    %c0_33 = arith.constant 0 : index
    %c0_34 = arith.constant 0 : index
    %c0_35 = arith.constant 0 : index
    %41 = vector.load %arg3[%c0_33, %c0_34, %c0_35] : memref<1x64x128xbf16, #tpu.memory_space<vmem>>, vector<1x64x128xbf16>
    %42 = vector.shape_cast %41 : vector<1x64x128xbf16> to vector<64x128xbf16>
    %43 = vector.shape_cast %40 : vector<64x128xbf16> to vector<1x64x128xbf16>
    tpu.vector_store %arg3[%c0_33, %c0_34, %c0_35], %43 {strides = array<i32>} : memref<1x64x128xbf16, #tpu.memory_space<vmem>>, vector<1x64x128xbf16>,
    %cst_36 = arith.constant dense<0.000000e+00> : vector<128xf32>
    %44 = vector.multi_reduction <add>, %39, %cst_36 [0] : vector<64x128xf32> to vector<128xf32>
    %45 = vector.shape_cast %44 : vector<128xf32> to vector<1x128xf32>
    %c0_37 = arith.constant 0 : index
    %c0_38 = arith.constant 0 : index
    %c0_39 = arith.constant 0 : index
    %46 = vector.load %arg4[%c0_37, %c0_38, %c0_39] : memref<1x2x128xf32, #tpu.memory_space<vmem>>, vector<1x1x128xf32>
    %47 = vector.shape_cast %46 : vector<1x1x128xf32> to vector<1x128xf32>
    %48 = vector.shape_cast %45 : vector<1x128xf32> to vector<1x1x128xf32>
    tpu.vector_store %arg4[%c0_37, %c0_38, %c0_39], %48 {strides = array<i32>} : memref<1x2x128xf32, #tpu.memory_space<vmem>>, vector<1x1x128xf32>,
    %49 = arith.mulf %39, %39 : vector<64x128xf32>
    %cst_40 = arith.constant dense<0.000000e+00> : vector<128xf32>
    %50 = vector.multi_reduction <add>, %49, %cst_40 [0] : vector<64x128xf32> to vector<128xf32>
    %51 = vector.shape_cast %50 : vector<128xf32> to vector<1x128xf32>
    %c0_41 = arith.constant 0 : index
    %c1_42 = arith.constant 1 : index
    %c0_43 = arith.constant 0 : index
    %52 = vector.load %arg4[%c0_41, %c1_42, %c0_43] : memref<1x2x128xf32, #tpu.memory_space<vmem>>, vector<1x1x128xf32>
    %53 = vector.shape_cast %52 : vector<1x1x128xf32> to vector<1x128xf32>
    %54 = vector.shape_cast %51 : vector<1x128xf32> to vector<1x1x128xf32>
    tpu.vector_store %arg4[%c0_41, %c1_42, %c0_43], %54 {strides = array<i32>} : memref<1x2x128xf32, #tpu.memory_space<vmem>>, vector<1x1x128xf32>,
    return
  }
  func.func @transform_0(%arg0: i32) -> (i32, i32, i32, i32, i32) {
    %c0_i32 = arith.constant 0 : i32
    %c0_i32_0 = arith.constant 0 : i32
    %c0_i32_1 = arith.constant 0 : i32
    %c0_i32_2 = arith.constant 0 : i32
    %c0_i32_3 = arith.constant 0 : i32
    return %arg0, %c0_i32, %c0_i32_0, %c0_i32_1, %c0_i32_2 : i32, i32, i32, i32, i32
  }
  func.func @transform_1(%arg0: i32) -> (i32, i32, i32) {
    %c0_i32 = arith.constant 0 : i32
    %c0_i32_0 = arith.constant 0 : i32
    %c0_i32_1 = arith.constant 0 : i32
    %c0_i32_2 = arith.constant 0 : i32
    return %c0_i32, %c0_i32_0, %c0_i32_1 : i32, i32, i32
  }
  func.func @transform_2(%arg0: i32) -> (i32, i32, i32) {
    %c0_i32 = arith.constant 0 : i32
    %c0_i32_0 = arith.constant 0 : i32
    %c0_i32_1 = arith.constant 0 : i32
    return %arg0, %c0_i32, %c0_i32_0 : i32, i32, i32
  }
  func.func @transform_3(%arg0: i32) -> (i32, i32, i32) {
    %c0_i32 = arith.constant 0 : i32
    %c0_i32_0 = arith.constant 0 : i32
    %c0_i32_1 = arith.constant 0 : i32
    return %arg0, %c0_i32, %c0_i32_0 : i32, i32, i32
  }
}

module attributes {stable_mosaic.version = 11 : i64} {
  func.func @_bn_relu_kernel(%arg0: i32, %arg1: memref<1x64x128xbf16, #tpu.memory_space<vmem>>, %arg2: memref<1x128xf32, #tpu.memory_space<vmem>>, %arg3: memref<1x128xf32, #tpu.memory_space<vmem>>, %arg4: memref<1x64x8xf32, #tpu.memory_space<vmem>>) attributes {dimension_semantics = [#tpu.dimension_semantics<parallel>], iteration_bounds = array<i64: 2>, scalar_prefetch = 0 : i64, scratch_operands = 0 : i64, tpu.core_type = #tpu.core_type<tc>, window_params = [{transform_indices = @transform_0, window_bounds = array<i64: 1, 64, 128>}, {pipeline_mode = #tpu.pipeline_mode<synchronous>, transform_indices = @transform_1, window_bounds = array<i64: 1, 128>}, {pipeline_mode = #tpu.pipeline_mode<synchronous>, transform_indices = @transform_2, window_bounds = array<i64: 1, 128>}, {transform_indices = @transform_3, window_bounds = array<i64: 1, 64, 8>}]} {
    %c0 = arith.constant 0 : index
    %c0_0 = arith.constant 0 : index
    %c0_1 = arith.constant 0 : index
    %0 = vector.load %arg1[%c0, %c0_0, %c0_1] : memref<1x64x128xbf16, #tpu.memory_space<vmem>>, vector<1x64x128xbf16>
    %1 = vector.shape_cast %0 : vector<1x64x128xbf16> to vector<64x128xbf16>
    %2 = arith.extf %1 : vector<64x128xbf16> to vector<64x128xf32>
    %c0_2 = arith.constant 0 : index
    %c0_3 = arith.constant 0 : index
    %3 = vector.load %arg2[%c0_2, %c0_3] : memref<1x128xf32, #tpu.memory_space<vmem>>, vector<1x128xf32>
    %4 = vector.broadcast %3 : vector<1x128xf32> to vector<64x128xf32>
    %5 = arith.mulf %2, %4 : vector<64x128xf32>
    %c0_4 = arith.constant 0 : index
    %c0_5 = arith.constant 0 : index
    %6 = vector.load %arg3[%c0_4, %c0_5] : memref<1x128xf32, #tpu.memory_space<vmem>>, vector<1x128xf32>
    %7 = vector.broadcast %6 : vector<1x128xf32> to vector<64x128xf32>
    %8 = arith.addf %5, %7 : vector<64x128xf32>
    %cst = arith.constant 0.000000e+00 : f32
    %9 = vector.broadcast %cst : f32 to vector<64x128xf32>
    %10 = arith.maximumf %8, %9 : vector<64x128xf32>
    %11 = vector.extract_strided_slice %10 {offsets = [0, 0], sizes = [64, 8], strides = [1, 1]} : vector<64x128xf32> to vector<64x8xf32>
    %c0_6 = arith.constant 0 : index
    %c0_7 = arith.constant 0 : index
    %c0_8 = arith.constant 0 : index
    %12 = vector.load %arg4[%c0_6, %c0_7, %c0_8] : memref<1x64x8xf32, #tpu.memory_space<vmem>>, vector<1x64x8xf32>
    %13 = vector.shape_cast %12 : vector<1x64x8xf32> to vector<64x8xf32>
    %14 = vector.shape_cast %11 : vector<64x8xf32> to vector<1x64x8xf32>
    tpu.vector_store %arg4[%c0_6, %c0_7, %c0_8], %14 {strides = array<i32>} : memref<1x64x8xf32, #tpu.memory_space<vmem>>, vector<1x64x8xf32>,
    return
  }
  func.func @transform_0(%arg0: i32) -> (i32, i32, i32) {
    %c0_i32 = arith.constant 0 : i32
    %c0_i32_0 = arith.constant 0 : i32
    %c0_i32_1 = arith.constant 0 : i32
    return %arg0, %c0_i32, %c0_i32_0 : i32, i32, i32
  }
  func.func @transform_1(%arg0: i32) -> (i32, i32) {
    %c0_i32 = arith.constant 0 : i32
    %c0_i32_0 = arith.constant 0 : i32
    %c0_i32_1 = arith.constant 0 : i32
    return %c0_i32, %c0_i32_0 : i32, i32
  }
  func.func @transform_2(%arg0: i32) -> (i32, i32) {
    %c0_i32 = arith.constant 0 : i32
    %c0_i32_0 = arith.constant 0 : i32
    %c0_i32_1 = arith.constant 0 : i32
    return %c0_i32, %c0_i32_0 : i32, i32
  }
  func.func @transform_3(%arg0: i32) -> (i32, i32, i32) {
    %c0_i32 = arith.constant 0 : i32
    %c0_i32_0 = arith.constant 0 : i32
    %c0_i32_1 = arith.constant 0 : i32
    return %arg0, %c0_i32, %c0_i32_0 : i32, i32, i32
  }
}

module attributes {stable_mosaic.version = 11 : i64} {
  func.func @_bn_relu_conv_stats_kernel(%arg0: i32, %arg1: memref<1x64x128xbf16, #tpu.memory_space<vmem>>, %arg2: memref<1x128xf32, #tpu.memory_space<vmem>>, %arg3: memref<1x128xf32, #tpu.memory_space<vmem>>, %arg4: memref<3x384x128xbf16, #tpu.memory_space<vmem>>, %arg5: memref<1x64x128xbf16, #tpu.memory_space<vmem>>, %arg6: memref<1x2x128xf32, #tpu.memory_space<vmem>>, %arg7: memref<10x8x384xbf16, #tpu.memory_space<vmem>>) attributes {dimension_semantics = [#tpu.dimension_semantics<parallel>], iteration_bounds = array<i64: 2>, scalar_prefetch = 0 : i64, scratch_operands = 1 : i64, tpu.core_type = #tpu.core_type<tc>, window_params = [{transform_indices = @transform_0, window_bounds = array<i64: 1, 64, 128>}, {pipeline_mode = #tpu.pipeline_mode<synchronous>, transform_indices = @transform_1, window_bounds = array<i64: 1, 128>}, {pipeline_mode = #tpu.pipeline_mode<synchronous>, transform_indices = @transform_2, window_bounds = array<i64: 1, 128>}, {pipeline_mode = #tpu.pipeline_mode<synchronous>, transform_indices = @transform_3, window_bounds = array<i64: 3, 384, 128>}, {transform_indices = @transform_4, window_bounds = array<i64: 1, 64, 128>}, {transform_indices = @transform_5, window_bounds = array<i64: 1, 2, 128>}]} {
    %c0 = arith.constant 0 : index
    %c0_0 = arith.constant 0 : index
    %c0_1 = arith.constant 0 : index
    %0 = vector.load %arg1[%c0, %c0_0, %c0_1] : memref<1x64x128xbf16, #tpu.memory_space<vmem>>, vector<1x64x128xbf16>
    %1 = vector.shape_cast %0 : vector<1x64x128xbf16> to vector<64x128xbf16>
    %2 = arith.extf %1 : vector<64x128xbf16> to vector<64x128xf32>
    %c0_2 = arith.constant 0 : index
    %c0_3 = arith.constant 0 : index
    %3 = vector.load %arg2[%c0_2, %c0_3] : memref<1x128xf32, #tpu.memory_space<vmem>>, vector<1x128xf32>
    %4 = vector.broadcast %3 : vector<1x128xf32> to vector<64x128xf32>
    %5 = arith.mulf %2, %4 : vector<64x128xf32>
    %c0_4 = arith.constant 0 : index
    %c0_5 = arith.constant 0 : index
    %6 = vector.load %arg3[%c0_4, %c0_5] : memref<1x128xf32, #tpu.memory_space<vmem>>, vector<1x128xf32>
    %7 = vector.broadcast %6 : vector<1x128xf32> to vector<64x128xf32>
    %8 = arith.addf %5, %7 : vector<64x128xf32>
    %cst = arith.constant 0.000000e+00 : f32
    %9 = vector.broadcast %cst : f32 to vector<64x128xf32>
    %10 = arith.maximumf %8, %9 : vector<64x128xf32>
    %11 = arith.truncf %10 : vector<64x128xf32> to vector<64x128xbf16>
    %12 = vector.shape_cast %11 : vector<64x128xbf16> to vector<8x8x128xbf16>
    %cst_6 = arith.constant 0.000000e+00 : bf16
    %13 = vector.broadcast %cst_6 : bf16 to vector<1x8x384xbf16>
    %c0_7 = arith.constant 0 : index
    %c0_8 = arith.constant 0 : index
    %c0_9 = arith.constant 0 : index
    %14 = vector.load %arg7[%c0_7, %c0_8, %c0_9] : memref<10x8x384xbf16, #tpu.memory_space<vmem>>, vector<1x8x384xbf16>
    tpu.vector_store %arg7[%c0_7, %c0_8, %c0_9], %13 {strides = array<i32>} : memref<10x8x384xbf16, #tpu.memory_space<vmem>>, vector<1x8x384xbf16>,
    %c9 = arith.constant 9 : index
    %c0_10 = arith.constant 0 : index
    %c0_11 = arith.constant 0 : index
    %15 = vector.load %arg7[%c9, %c0_10, %c0_11] : memref<10x8x384xbf16, #tpu.memory_space<vmem>>, vector<1x8x384xbf16>
    tpu.vector_store %arg7[%c9, %c0_10, %c0_11], %13 {strides = array<i32>} : memref<10x8x384xbf16, #tpu.memory_space<vmem>>, vector<1x8x384xbf16>,
    %cst_12 = arith.constant 0.000000e+00 : bf16
    %16 = vector.broadcast %cst_12 : bf16 to vector<8x1x128xbf16>
    %17 = vector.extract_strided_slice %12 {offsets = [0, 0, 0], sizes = [8, 7, 128], strides = [1, 1, 1]} : vector<8x8x128xbf16> to vector<8x7x128xbf16>
    %18 = tpu.concatenate %16, %17 in 1 : vector<8x1x128xbf16>, vector<8x7x128xbf16> -> vector<8x8x128xbf16>
    %19 = vector.extract_strided_slice %12 {offsets = [0, 1, 0], sizes = [8, 7, 128], strides = [1, 1, 1]} : vector<8x8x128xbf16> to vector<8x7x128xbf16>
    %20 = tpu.concatenate %19, %16 in 1 : vector<8x7x128xbf16>, vector<8x1x128xbf16> -> vector<8x8x128xbf16>
    %21 = tpu.concatenate %18, %12, %20 in 2 : vector<8x8x128xbf16>, vector<8x8x128xbf16>, vector<8x8x128xbf16> -> vector<8x8x384xbf16>
    %c1 = arith.constant 1 : index
    %c0_13 = arith.constant 0 : index
    %c0_14 = arith.constant 0 : index
    %22 = vector.load %arg7[%c1, %c0_13, %c0_14] : memref<10x8x384xbf16, #tpu.memory_space<vmem>>, vector<8x8x384xbf16>
    tpu.vector_store %arg7[%c1, %c0_13, %c0_14], %21 {strides = array<i32>} : memref<10x8x384xbf16, #tpu.memory_space<vmem>>, vector<8x8x384xbf16>,
    %cst_15 = arith.constant 0.000000e+00 : f32
    %23 = vector.broadcast %cst_15 : f32 to vector<64x128xf32>
    %c0_16 = arith.constant 0 : index
    %c0_17 = arith.constant 0 : index
    %c0_18 = arith.constant 0 : index
    %24 = vector.load %arg7[%c0_16, %c0_17, %c0_18] : memref<10x8x384xbf16, #tpu.memory_space<vmem>>, vector<8x8x384xbf16>
    %25 = vector.shape_cast %24 : vector<8x8x384xbf16> to vector<64x384xbf16>
    %c0_19 = arith.constant 0 : index
    %c0_20 = arith.constant 0 : index
    %c0_21 = arith.constant 0 : index
    %26 = vector.load %arg4[%c0_19, %c0_20, %c0_21] : memref<3x384x128xbf16, #tpu.memory_space<vmem>>, vector<1x384x128xbf16>
    %27 = vector.shape_cast %26 : vector<1x384x128xbf16> to vector<384x128xbf16>
    %cst_22 = arith.constant dense<0.000000e+00> : vector<64x128xf32>
    %28 = tpu.matmul %25, %27, %cst_22 {dimension_numbers = #tpu.dot_dimension_numbers<[1], [0], [0], [1], [0, 0, 1, 1], [], []>} : vector<64x384xbf16>, vector<384x128xbf16>, vector<64x128xf32> -> vector<64x128xf32>
    %29 = arith.addf %23, %28 : vector<64x128xf32>
    %c1_23 = arith.constant 1 : index
    %c0_24 = arith.constant 0 : index
    %c0_25 = arith.constant 0 : index
    %30 = vector.load %arg7[%c1_23, %c0_24, %c0_25] : memref<10x8x384xbf16, #tpu.memory_space<vmem>>, vector<8x8x384xbf16>
    %31 = vector.shape_cast %30 : vector<8x8x384xbf16> to vector<64x384xbf16>
    %c1_26 = arith.constant 1 : index
    %c0_27 = arith.constant 0 : index
    %c0_28 = arith.constant 0 : index
    %32 = vector.load %arg4[%c1_26, %c0_27, %c0_28] : memref<3x384x128xbf16, #tpu.memory_space<vmem>>, vector<1x384x128xbf16>
    %33 = vector.shape_cast %32 : vector<1x384x128xbf16> to vector<384x128xbf16>
    %cst_29 = arith.constant dense<0.000000e+00> : vector<64x128xf32>
    %34 = tpu.matmul %31, %33, %cst_29 {dimension_numbers = #tpu.dot_dimension_numbers<[1], [0], [0], [1], [0, 0, 1, 1], [], []>} : vector<64x384xbf16>, vector<384x128xbf16>, vector<64x128xf32> -> vector<64x128xf32>
    %35 = arith.addf %29, %34 : vector<64x128xf32>
    %c2 = arith.constant 2 : index
    %c0_30 = arith.constant 0 : index
    %c0_31 = arith.constant 0 : index
    %36 = vector.load %arg7[%c2, %c0_30, %c0_31] : memref<10x8x384xbf16, #tpu.memory_space<vmem>>, vector<8x8x384xbf16>
    %37 = vector.shape_cast %36 : vector<8x8x384xbf16> to vector<64x384xbf16>
    %c2_32 = arith.constant 2 : index
    %c0_33 = arith.constant 0 : index
    %c0_34 = arith.constant 0 : index
    %38 = vector.load %arg4[%c2_32, %c0_33, %c0_34] : memref<3x384x128xbf16, #tpu.memory_space<vmem>>, vector<1x384x128xbf16>
    %39 = vector.shape_cast %38 : vector<1x384x128xbf16> to vector<384x128xbf16>
    %cst_35 = arith.constant dense<0.000000e+00> : vector<64x128xf32>
    %40 = tpu.matmul %37, %39, %cst_35 {dimension_numbers = #tpu.dot_dimension_numbers<[1], [0], [0], [1], [0, 0, 1, 1], [], []>} : vector<64x384xbf16>, vector<384x128xbf16>, vector<64x128xf32> -> vector<64x128xf32>
    %41 = arith.addf %35, %40 : vector<64x128xf32>
    %42 = arith.truncf %41 : vector<64x128xf32> to vector<64x128xbf16>
    %c0_36 = arith.constant 0 : index
    %c0_37 = arith.constant 0 : index
    %c0_38 = arith.constant 0 : index
    %43 = vector.load %arg5[%c0_36, %c0_37, %c0_38] : memref<1x64x128xbf16, #tpu.memory_space<vmem>>, vector<1x64x128xbf16>
    %44 = vector.shape_cast %43 : vector<1x64x128xbf16> to vector<64x128xbf16>
    %45 = vector.shape_cast %42 : vector<64x128xbf16> to vector<1x64x128xbf16>
    tpu.vector_store %arg5[%c0_36, %c0_37, %c0_38], %45 {strides = array<i32>} : memref<1x64x128xbf16, #tpu.memory_space<vmem>>, vector<1x64x128xbf16>,
    %cst_39 = arith.constant dense<0.000000e+00> : vector<128xf32>
    %46 = vector.multi_reduction <add>, %41, %cst_39 [0] : vector<64x128xf32> to vector<128xf32>
    %47 = vector.shape_cast %46 : vector<128xf32> to vector<1x128xf32>
    %c0_40 = arith.constant 0 : index
    %c0_41 = arith.constant 0 : index
    %c0_42 = arith.constant 0 : index
    %48 = vector.load %arg6[%c0_40, %c0_41, %c0_42] : memref<1x2x128xf32, #tpu.memory_space<vmem>>, vector<1x1x128xf32>
    %49 = vector.shape_cast %48 : vector<1x1x128xf32> to vector<1x128xf32>
    %50 = vector.shape_cast %47 : vector<1x128xf32> to vector<1x1x128xf32>
    tpu.vector_store %arg6[%c0_40, %c0_41, %c0_42], %50 {strides = array<i32>} : memref<1x2x128xf32, #tpu.memory_space<vmem>>, vector<1x1x128xf32>,
    %51 = arith.mulf %41, %41 : vector<64x128xf32>
    %cst_43 = arith.constant dense<0.000000e+00> : vector<128xf32>
    %52 = vector.multi_reduction <add>, %51, %cst_43 [0] : vector<64x128xf32> to vector<128xf32>
    %53 = vector.shape_cast %52 : vector<128xf32> to vector<1x128xf32>
    %c0_44 = arith.constant 0 : index
    %c1_45 = arith.constant 1 : index
    %c0_46 = arith.constant 0 : index
    %54 = vector.load %arg6[%c0_44, %c1_45, %c0_46] : memref<1x2x128xf32, #tpu.memory_space<vmem>>, vector<1x1x128xf32>
    %55 = vector.shape_cast %54 : vector<1x1x128xf32> to vector<1x128xf32>
    %56 = vector.shape_cast %53 : vector<1x128xf32> to vector<1x1x128xf32>
    tpu.vector_store %arg6[%c0_44, %c1_45, %c0_46], %56 {strides = array<i32>} : memref<1x2x128xf32, #tpu.memory_space<vmem>>, vector<1x1x128xf32>,
    return
  }
  func.func @transform_0(%arg0: i32) -> (i32, i32, i32) {
    %c0_i32 = arith.constant 0 : i32
    %c0_i32_0 = arith.constant 0 : i32
    %c0_i32_1 = arith.constant 0 : i32
    return %arg0, %c0_i32, %c0_i32_0 : i32, i32, i32
  }
  func.func @transform_1(%arg0: i32) -> (i32, i32) {
    %c0_i32 = arith.constant 0 : i32
    %c0_i32_0 = arith.constant 0 : i32
    %c0_i32_1 = arith.constant 0 : i32
    return %c0_i32, %c0_i32_0 : i32, i32
  }
  func.func @transform_2(%arg0: i32) -> (i32, i32) {
    %c0_i32 = arith.constant 0 : i32
    %c0_i32_0 = arith.constant 0 : i32
    %c0_i32_1 = arith.constant 0 : i32
    return %c0_i32, %c0_i32_0 : i32, i32
  }
  func.func @transform_3(%arg0: i32) -> (i32, i32, i32) {
    %c0_i32 = arith.constant 0 : i32
    %c0_i32_0 = arith.constant 0 : i32
    %c0_i32_1 = arith.constant 0 : i32
    %c0_i32_2 = arith.constant 0 : i32
    return %c0_i32, %c0_i32_0, %c0_i32_1 : i32, i32, i32
  }
  func.func @transform_4(%arg0: i32) -> (i32, i32, i32) {
    %c0_i32 = arith.constant 0 : i32
    %c0_i32_0 = arith.constant 0 : i32
    %c0_i32_1 = arith.constant 0 : i32
    return %arg0, %c0_i32, %c0_i32_0 : i32, i32, i32
  }
  func.func @transform_5(%arg0: i32) -> (i32, i32, i32) {
    %c0_i32 = arith.constant 0 : i32
    %c0_i32_0 = arith.constant 0 : i32
    %c0_i32_1 = arith.constant 0 : i32
    return %arg0, %c0_i32, %c0_i32_0 : i32, i32, i32
  }
}

</mosaic_0001>

<bundles_post_ra>
// kernel: contracter_forward.5
= control target key start
LH: loop header
LB: loop body
LE: loop exit
PB: predicated region body
PF: predicated region fallthrough
CT: control target
= control target key end

     0   :  { %8 = vsyncpa [#allocation3], 0  ;;  %s922_s0 = inlined_call_operand.hbm [shape: bf16[2,64,128], index: 0, kind: input, shape index: {}]   ;;  %s923_s1 = inlined_call_operand.hbm [shape: f32[1,128], index: 1, kind: input, shape index: {}]   ;;  %s924_s2 = inlined_call_operand.hbm [shape: f32[1,128], index: 2, kind: input, shape index: {}]   ;;  %s925_s3 = inlined_call_operand.hbm [shape: f32[2,64,8], index: 3, kind: output, shape index: {}]  }
   0x1   :  { %10 = vsyncpa [#allocation3 + $0x1], 0 }
   0x2   :  { %11 = vsyncpa [#allocation6], 0 }
   0x3   :  { %12 = vsyncpa [#allocation4], 0 }
   0x4   :  { %14 = vsyncpa [#allocation4 + $0x1], 0  ;;  %s681_s12 = smov 0   ;;  %s683_s13 = smov 0  }
   0x5   :  { %s685_s14 = smov 0   ;;  %s687_s15 = smov 0  }
   0x6 LB: > { %s702_s16 = sadd.s32 4294967295, %s651_s15   ;;  %s383_s17 = sadd.s32 4294967294, %s651_s15   ;;  %s651_s15 = sphi %s687_s15, %s950_s15   ;;  %s647_s14 = sphi %s685_s14, %s949_s14   ;;  %s643_s13 = sphi %s683_s13, %s948_s13   ;;  %s639_s12 = sphi %s681_s12, %s947_s12  }
   0x7   : > { %s706_s18 = sadd.s32 1, %s651_s15   ;;  %s27_s19 = sadd.s32 1, %s647_s14 }
   0x8   : > { %s24_s20 = ssub.s32 %s651_s15, %s706_s18  ;;  %p34_p0 = scmp.ne.s32.totalorder %s647_s14, %s643_s13 }
   0x9   : > { %p25_p1 = scmp.eq.s32.totalorder %s24_s20, 0  ;;  %p35_p2 = scmp.eq.s32.totalorder %s651_s15, 0 }
   0xa   : > { %p40_p3 = scmp.ne.s32.totalorder %s643_s13, %s639_s12  ;;  %p926_p4 = scmp.eq.s32.totalorder %s702_s16, 0 }
   0xb   : > { %s718_s21 = scalar_select %p25_p1, %s647_s14, %s27_s19  }
   0xc   : > { %p720_p5 = por %p35_p2, %p34_p0  ;;  %p726_p6 = por %p926_p4, %p40_p3 }
   0xd   : > { %p106_p7 = scmp.eq.s32.totalorder %s702_s16, 1  ;;  %p112_p8 = scmp.eq.s32.totalorder %s383_s17, 1 }
   0xe   : > { %s932_s23 = scalar_select %p726_p6, 1, 0 }
   0xf   : > { %p384_p9 = scmp.ge.s32.totalorder %s651_s15, 1  ;;  %p119_p10 = scmp.lt.s32.totalorder %s651_s15, 3 }
  0x10   : > { %p733_p11 = por %p106_p7, %p34_p0  ;;  %p737_p12 = por %p112_p8, %p40_p3 }
  0x11   : > { %p741_p13 = pnand %p384_p9, %p119_p10  ;;  %s653_s27 = smov [#allocation5]  }
  0x12   : > { %s933_s24 = scalar_select %p733_p11, 1, 0 }
  0x13   : > { %s934_s25 = scalar_select %p737_p12, 1, 0 }
  0x14   : > { %s935_s26 = scalar_select %p741_p13, 1, 0 }
  0x15   : > { %p436_p2 = pneg %p741_p13  ;;  %s132_s28 = sshll.u32 %s653_s27, 4  ;;  %s133_s28 = int_to_ptr.vmem [resolvable:$true] %s132_s28 }
  0x16   : > { %p453_p4 = scmp.lt.s32.totalorder %s651_s15, 2  ;;  %p936_p0 = scmp.eq.s32.totalorder %s702_s16, 0 }
  0x17   : > { %s654_s4 = smov [#allocation7]   ;;  %s495_s8 = scalar_lea.hbm %s923_s1, 16 }
  0x18   : > { %p751_p7 = pnand %p436_p2, %p936_p0  ;;  %p757_p3 = pnand %p453_p4, %p720_p5 }
  0x19   : > { %s143_s5 = sshll.u32 %s654_s4, 4  ;;  %p496_p8 = scmp.ne.s32.totalorder %s923_s1, %s495_s8  ;;  %s761_s5 = int_to_ptr.vmem [resolvable:$true] %s143_s5 }
  0x1a   : > { %s938_s30 = scalar_select %p757_p3, 1, 0 }
  0x1b   : > { %p497_p9 = pneg %p751_p7  ;;  %p502_p10 = scmp.lt.u32.totalorder %s495_s8, %s923_s1 }
  0x1d   : > { %p498_p4 = pnand %p497_p9, %p496_p8 }
  0x1f   : > { %p499_p5 = pneg %p498_p4 }
  0x21   : > { %p504_p2 = pnand %p502_p10, %p499_p5 }
  0x23   : > { %507 = shalt.err (!%p504_p2)
}
  0x24   : > { %s508_s19 = scalar_lea.vmem %s133_s28, 16  ;;  %s515_s20 = scalar_lea.vmem %s133_s28, 32 }
  0x25   : > { %p509_p0 = scmp.ne.s32.totalorder %s133_s28, %s508_s19  ;;  %p516_p11 = scmp.lt.s32.totalorder %s133_s28, %s133_s28 }
  0x26   : > { %p517_p6 = scmp.lt.s32.totalorder %s515_s20, %s508_s19 }
  0x27   : > { %p511_p1 = pnand %p509_p0, %p497_p9 }
  0x28   : > { %p518_p13 = por %p517_p6, %p516_p11 }
  0x29   : > { %p512_p12 = pneg %p511_p1 }
  0x2b   : > { %p519_p3 = pnand %p518_p13, %p512_p12 }
  0x2d   : > { %522 = shalt.err (!%p519_p3)
}
  0x2e   : > { %439 = dma.hbm_to_vmem [thread:$0]  (!%p751_p7), %s923_s1, 16, %s133_s28, [#allocation6]  }
  0x2f   : > { %s154_s4 = sand.u32 1, %s647_s14   ;;  %s523_s8 = scalar_lea.hbm %s924_s2, 16 }
  0x30   : > { %p524_p1 = scmp.ne.s32.totalorder %s924_s2, %s523_s8  ;;  %p530_p12 = scmp.lt.u32.totalorder %s523_s8, %s924_s2 }
  0x32   : > { %p526_p6 = pnand %p524_p1, %p497_p9 }
  0x34   : > { %p527_p11 = pneg %p526_p6 }
  0x36   : > { %p532_p13 = pnand %p530_p12, %p527_p11 }
  0x38   : > { %535 = shalt.err (!%p532_p13)
}
  0x39   : > { %s536_s28 = scalar_lea.vmem %s761_s5, 16  ;;  %s543_s19 = scalar_lea.vmem %s761_s5, 32 }
  0x3a   : > { %p537_p3 = scmp.ne.s32.totalorder %s761_s5, %s536_s28  ;;  %p544_p5 = scmp.lt.s32.totalorder %s761_s5, %s761_s5 }
  0x3b   : > { %p545_p10 = scmp.lt.s32.totalorder %s543_s19, %s536_s28 }
  0x3c   : > { %p539_p8 = pnand %p537_p3, %p497_p9 }
  0x3d   : > { %p546_p2 = por %p545_p10, %p544_p5 }
  0x3e   : > { %p540_p4 = pneg %p539_p8 }
  0x40   : > { %p547_p0 = pnand %p546_p2, %p540_p4 }
  0x42   : > { %550 = shalt.err (!%p547_p0)
}
  0x43   : > { %442 = dma.hbm_to_vmem [thread:$0]  (!%p751_p7), %s924_s2, 16, %s761_s5, [#allocation6]  }
  0x44   : > { %s388_s27 = sshll.u32 %s154_s4, 5  ;;  %s403_s6 = sshll.u32 %s651_s15, 9 }
  0x45   : > { %s816_s9 = scalar_lea.hbm %s922_s0, %s403_s6  ;;  %s158_s29 = scalar_lea.vmem [#allocation2], %s388_s27 }
  0x46   : > { %s165_s10 = sshll.u32 %s158_s29, 4  ;;  %s820_s11 = scalar_lea.sflag [#allocation3], %s154_s4  ;;  %s818_s10 = int_to_ptr.vmem [resolvable:$true] %s165_s10 }
  0x47   : > { %s551_s17 = scalar_lea.hbm %s816_s9, 512  ;;  %p939_p7 = scmp.ne.s32.totalorder %s938_s30, 0 }
  0x48   : > { %p552_p9 = scmp.ne.s32.totalorder %s816_s9, %s551_s17  ;;  %s556_s19 = scalar_lea.hbm %s922_s0, 1024 }
  0x49   : > { %p553_p1 = pneg %p939_p7  ;;  %p557_p12 = scmp.lt.u32.totalorder %s816_s9, %s922_s0 }
  0x4a   : > { %p558_p13 = scmp.lt.u32.totalorder %s556_s19, %s551_s17  ;;  %p560_p8 = scmp.lt.u32.totalorder %s551_s17, %s816_s9 }
  0x4b   : > { %p554_p6 = pnand %p553_p1, %p552_p9 }
  0x4c   : > { %p559_p3 = por %p558_p13, %p557_p12 }
  0x4d   : > { %p555_p11 = pneg %p554_p6 }
  0x4e   : > { %p561_p4 = por %p560_p8, %p559_p3 }
  0x50   : > { %p562_p5 = pnand %p561_p4, %p555_p11 }
  0x52   : > { %565 = shalt.err (!%p562_p5)
}
  0x53   : > { %s566_s4 = scalar_lea.vmem %s818_s10, 512  ;;  %s655_s27 = smov [#allocation2]  }
  0x54   : > { %p567_p10 = scmp.ne.s32.totalorder %s818_s10, %s566_s4  ;;  %s571_s6 = sshll.u32 %s655_s27, 4  ;;  %s572_s6 = int_to_ptr.vmem [resolvable:$false] %s571_s6 }
  0x55   : > { %s573_s7 = scalar_lea.vmem %s572_s6, 1024  ;;  %p574_p9 = scmp.lt.s32.totalorder %s818_s10, %s572_s6 }
  0x56   : > { %p569_p2 = pnand %p567_p10, %p553_p1  ;;  %p575_p6 = scmp.lt.s32.totalorder %s573_s7, %s566_s4 }
  0x58   : > { %p570_p0 = pneg %p569_p2  ;;  %p576_p12 = por %p575_p6, %p574_p9 }
  0x5a   : > { %p577_p13 = pnand %p576_p12, %p570_p0 }
  0x5c   : > { %580 = shalt.err (!%p577_p13)
}
  0x5d   : > { %s656_s8 = smov 64   ;;  %s657_s29 = smov 4  }
  0x5e   : > { %446 = dma.hbm_to_vmem [thread:$0]  (!%p939_p7), %s816_s9, 512, %s818_s10, %s820_s11, %s656_s8, %s656_s8, %s657_s29  }
  0x5f   : > { %p940_p1 = scmp.ne.s32.totalorder %s935_s26, 0 }
  0x60   : > { %s851_s17 = sand.u32 (!%p940_p1), 1, %s643_s13   ;;  %p941_p11 = scmp.ne.s32.totalorder (!%p940_p1), %s932_s23, 0 }
  0x61   : > { %177 = sbr.rel (%p940_p1) target bundleno = 135 (0x87), region = 32  ;;  %s392_s5 = sshll.u32 (!%p940_p1), %s851_s17, 5 }
  0x62   : > { %s180_s28 = scalar_lea.sflag (!%p940_p1), [#allocation3], %s851_s17  ;;  %s183_s19 = scalar_lea.vmem (!%p940_p1), [#allocation2], %s392_s5 }
  0x68   : > { %626 = dma.done.wait (%p941_p11), %s180_s28, 512  }
  0x69   : > { %628 = vsyncadd (%p941_p11), %s180_s28, 4294966784  ;;  %p942_p3 = scmp.eq.s32.totalorder %s702_s16, 0 }
  0x6b   : > { %630 = dma.done.wait (%p942_p3), [#allocation6], 32   ;;  %p943_p7 = pmov %p942_p3 }
  0x6c   : > { %s395_s26 = sshll.u32 %s851_s17, 6  ;;  %v406_v0 = vld [vmem:[%s183_s19] sm:$0xff]   ;;  %vm268_vm0 = vcmask 64512   ;;  %v421_v4 = vld [vmem:[%s183_s19 + $0x8] sm:$0xff]   ;;  %v422_v5 = vld [vmem:[%s183_s19 + $0x10] sm:$0xff]   ;;  %s404_s9 = sshll.u32 %s702_s16, 10 }
  0x6d   : > { %632 = vsyncadd (%p943_p7), [#allocation6], 4294967264  ;;  %v396_v1 = vld [vmem:[#allocation5] ss:$0 sm:$0xff]  ;;  %v407_v2 = vunpack.c.l.bf16 %v406_v0  ;;  %v408_v3 = vunpack.c.h.bf16 %v406_v0  ;;  %v423_v6 = vld [vmem:[%s183_s19 + $0x18] sm:$0xff]   ;;  %v411_v8 = vunpack.c.l.bf16 %v421_v4  ;;  %v412_v9 = vunpack.c.h.bf16 %v421_v4  ;;  %s213_s23 = scalar_lea.vmem [#allocation8], %s395_s26  ;;  %s870_s11 = scalar_lea.hbm %s925_s3, %s404_s9 }
  0x6e   : > { %v397_v7 = vld [vmem:[#allocation7] ss:$0 sm:$0xff]  ;;  %v415_v10 = vunpack.c.l.bf16 %v422_v5  ;;  %v416_v11 = vunpack.c.h.bf16 %v422_v5  ;;  %v419_v14 = vunpack.c.l.bf16 %v423_v6  ;;  %v420_v15 = vunpack.c.h.bf16 %v423_v6  ;;  %s291_s30 = sshll.u32 %s213_s23, 4  ;;  %s278_s20 = scalar_lea.sflag [#allocation4], %s851_s17  ;;  %s865_s30 = int_to_ptr.vmem [resolvable:$true] %s291_s30 }
  0x6f   : > { %v237_v12 = vmul.f32 %v407_v2, %v396_v1  ;;  %v238_v13 = vmul.f32 %v408_v3, %v396_v1  ;;  %v239_v16 = vmul.f32 %v411_v8, %v396_v1  ;;  %v240_v17 = vmul.f32 %v412_v9, %v396_v1  ;;  %s581_s22 = scalar_lea.vmem %s865_s30, 1024  ;;  %p944_p4 = scmp.ne.s32.totalorder %s933_s24, 0 }
  0x70   : > { %v241_v18 = vmul.f32 %v415_v10, %v396_v1  ;;  %v242_v19 = vmul.f32 %v416_v11, %v396_v1  ;;  %v243_v22 = vmul.f32 %v419_v14, %v396_v1  ;;  %v244_v23 = vmul.f32 %v420_v15, %v396_v1  ;;  %p582_p8 = scmp.ne.s32.totalorder %s865_s30, %s581_s22  ;;  %s658_s4 = smov [#allocation8]  }
  0x71   : > { %v252_v20 = vadd.f32 %v397_v7, %v237_v12  ;;  %v253_v21 = vadd.f32 %v397_v7, %v238_v13  ;;  %v254_v24 = vadd.f32 %v397_v7, %v239_v16  ;;  %v255_v25 = vadd.f32 %v397_v7, %v240_v17  ;;  %s585_s27 = sshll.u32 %s658_s4, 4  ;;  %s586_s27 = int_to_ptr.vmem [resolvable:$false] %s585_s27 }
  0x72   : > { %v256_v26 = vadd.f32 %v397_v7, %v241_v18  ;;  %v257_v27 = vadd.f32 %v397_v7, %v242_v19  ;;  %v258_v30 = vadd.f32 %v397_v7, %v243_v22  ;;  %v259_v31 = vadd.f32 %v397_v7, %v244_v23  ;;  %p583_p5 = pnand %p582_p8, %p944_p4  ;;  %s587_s6 = scalar_lea.vmem %s586_s27, 2048 }
  0x73   : > { %v260_v28 = vmax.f32 %v252_v20, 0.0  ;;  %v261_v29 = vmax.f32 %v253_v21, 0.0  ;;  %v262_v32 = vmax.f32 %v254_v24, 0.0  ;;  %v263_v33 = vmax.f32 %v255_v25, 0.0  ;;  %p588_p2 = scmp.lt.s32.totalorder %s865_s30, %s586_s27  ;;  %p589_p0 = scmp.lt.s32.totalorder %s587_s6, %s581_s22 }
  0x74   : > { %v264_v34 = vmax.f32 %v256_v26, 0.0  ;;  %v265_v35 = vmax.f32 %v257_v27, 0.0  ;;  %v266_v36 = vmax.f32 %v258_v30, 0.0  ;;  %v267_v37 = vmax.f32 %v259_v31, 0.0  ;;  %p584_p10 = pneg %p583_p5 }
  0x75   : > { %269 = vst.msk [vmem:[%s213_s23] sm:$0xff] %vm268_vm0, %v260_v28  ;;  %270 = vst.msk [vmem:[%s213_s23 + $0x8] sm:$0xff] %vm268_vm0, %v261_v29  ;;  %p590_p9 = por %p589_p0, %p588_p2 }
  0x76   : > { %271 = vst.msk [vmem:[%s213_s23 + $0x10] sm:$0xff] %vm268_vm0, %v262_v32  ;;  %272 = vst.msk [vmem:[%s213_s23 + $0x18] sm:$0xff] %vm268_vm0, %v263_v33 }
  0x77   : > { %273 = vst.msk [vmem:[%s213_s23 + $0x20] sm:$0xff] %vm268_vm0, %v264_v34  ;;  %274 = vst.msk [vmem:[%s213_s23 + $0x28] sm:$0xff] %vm268_vm0, %v265_v35  ;;  %p591_p6 = pnand %p590_p9, %p584_p10 }
  0x78   : > { %275 = vst.msk [vmem:[%s213_s23 + $0x30] sm:$0xff] %vm268_vm0, %v266_v36  ;;  %276 = vst.msk [vmem:[%s213_s23 + $0x38] sm:$0xff] %vm268_vm0, %v267_v37 }
  0x79   : > { %594 = shalt.err (!%p591_p6)
}
  0x7a   : > { %s595_s7 = scalar_lea.hbm %s870_s11, 1024  ;;  %s599_s5 = scalar_lea.hbm %s925_s3, 2048 }
  0x7b   : > { %p596_p12 = scmp.ne.s32.totalorder %s870_s11, %s595_s7  ;;  %p600_p11 = scmp.lt.u32.totalorder %s870_s11, %s925_s3 }
  0x7c   : > { %p601_p3 = scmp.lt.u32.totalorder %s599_s5, %s595_s7  ;;  %p603_p8 = scmp.lt.u32.totalorder %s595_s7, %s870_s11 }
  0x7d   : > { %p597_p13 = pnand %p596_p12, %p944_p4 }
  0x7e   : > { %p602_p7 = por %p601_p3, %p600_p11 }
  0x7f   : > { %p598_p1 = pneg %p597_p13 }
  0x80   : > { %p604_p5 = por %p603_p8, %p602_p7 }
  0x82   : > { %p605_p10 = pnand %p604_p5, %p598_p1 }
  0x84   : > { %608 = shalt.err (!%p605_p10)
}
  0x85   : > { %s659_s26 = smov 128   ;;  %s660_s23 = smov 8  }
  0x86   : > { %434 = dma.vmem_to_hbm [thread:$0]  (%p944_p4), %s865_s30, 1024, %s870_s11, %s278_s20, %s659_s26, %s659_s26, %s660_s23  }
  0x87 PF: > { %s306_s9 = sand.u32 1, %s639_s12   ;;  %p945_p2 = scmp.ne.s32.totalorder %s934_s25, 0 }
  0x88   : > { %p946_p0 = scmp.ge.s32.totalorder %s651_s15, 2  ;;  %s307_s10 = scalar_lea.sflag [#allocation4], %s306_s9 }
  0x8a   : > { %p448_p9 = pnand %p946_p0, %p945_p2 }
  0x8c   : > { %634 = dma.done.wait (!%p448_p9), %s307_s10, 1024  }
  0x8d   : > { %636 = vsyncadd (!%p448_p9), %s307_s10, 4294966272  ;;  %p17_p6 = scmp.ge.s32.totalorder %s706_s18, 4   ;;  %s947_s12 = smov %s643_s13 }
  0x8e   : > { %s948_s13 = smov %s647_s14  ;;  %s949_s14 = smov %s718_s21 }
  0x8f   : > { %s950_s15 = smov %s706_s18  ;;  %19 = sbr.rel (!%p17_p6) target bundleno = 6 (0x6), region = 85 }
  0x96   :  { %312 = vsyncpa [#allocation3], 1 }
  0x97   :  { %314 = vsyncpa [#allocation3 + $0x1], 1 }
  0x98   :  { %315 = vsyncpa [#allocation6], 1 }
  0x99   :  { %316 = vsyncpa [#allocation4], 1 }
  0x9a   :  { %318 = vsyncpa [#allocation4 + $0x1], 1 }

// kernel: contracter_forward.3
= control target key start
LH: loop header
LB: loop body
LE: loop exit
PB: predicated region body
PF: predicated region fallthrough
CT: control target
= control target key end

     0   :  { %9 = vsyncpa [#allocation4], 0  ;;  %s1936_s0 = inlined_call_operand.hbm [shape: f32[2,8,2,8,8], index: 0, kind: input, shape index: {}]   ;;  %s1937_s1 = inlined_call_operand.hbm [shape: bf16[3,12,128], index: 1, kind: input, shape index: {}]   ;;  %s1938_s2 = inlined_call_operand.hbm [shape: bf16[2,64,128], index: 2, kind: output, shape index: {0}]   ;;  %s1939_s3 = inlined_call_operand.hbm [shape: f32[2,2,128], index: 3, kind: output, shape index: {1}]  }
   0x1   :  { %11 = vsyncpa [#allocation4 + $0x1], 0 }
   0x2   :  { %12 = vsyncpa [#allocation7], 0 }
   0x3   :  { %13 = vsyncpa [#allocation5], 0 }
   0x4   :  { %15 = vsyncpa [#allocation5 + $0x1], 0 }
   0x5   :  { %16 = vsyncpa [#allocation10], 0 }
   0x6   :  { %18 = vsyncpa [#allocation10 + $0x1], 0  ;;  %s1545_s12 = smov 0   ;;  %s1547_s13 = smov 0  }
   0x7   :  { %s1549_s14 = smov 0   ;;  %s1551_s15 = smov 0  }
   0x8 LB: > { %s1566_s16 = sadd.s32 4294967295, %s1510_s15   ;;  %s1090_s17 = sadd.s32 4294967294, %s1510_s15   ;;  %s1510_s15 = sphi %s1551_s15, %s1963_s15   ;;  %s1506_s14 = sphi %s1549_s14, %s1962_s14   ;;  %s1502_s13 = sphi %s1547_s13, %s1961_s13   ;;  %s1498_s12 = sphi %s1545_s12, %s1960_s12  }
   0x9   : > { %p44_p0 = scmp.ne.s32.totalorder %s1502_s13, %s1498_s12  ;;  %p1940_p1 = scmp.eq.s32.totalorder %s1566_s16, 0 }
   0xa   : > { %p95_p3 = scmp.eq.s32.totalorder %s1090_s17, 1  ;;  %p1091_p5 = scmp.ge.s32.totalorder %s1510_s15, 1 }
   0xb   : > { %p1575_p4 = por %p1940_p1, %p44_p0  ;;  %p128_p7 = scmp.lt.s32.totalorder %s1510_s15, 3 }
   0xc   : > { %p1580_p6 = por %p95_p3, %p44_p0  ;;  %s1512_s21 = smov [#allocation6]  }
   0xd   : > { %s1943_s18 = scalar_select %p1575_p4, 1, 0 }
   0xe   : > { %s1944_s19 = scalar_select %p1580_p6, 1, 0 }
   0xf   : > { %p1585_p8 = pnand %p1091_p5, %p128_p7  ;;  %s140_s22 = sshll.u32 %s1512_s21, 4  ;;  %s1589_s22 = int_to_ptr.vmem [resolvable:$true] %s140_s22 }
  0x10   : > { %s1601_s24 = sadd.s32 1, %s1510_s15   ;;  %s31_s25 = sadd.s32 1, %s1506_s14 }
  0x11   : > { %s1945_s20 = scalar_select %p1585_p8, 1, 0 }
  0x12   : > { %p1254_p9 = pneg %p1585_p8  ;;  %s28_s26 = ssub.s32 %s1510_s15, %s1601_s24 }
  0x13   : > { %s1350_s29 = scalar_lea.hbm %s1937_s1, 384 }
  0x14   : > { %p1596_p11 = pnand %p1254_p9, %p1940_p1  ;;  %p1351_p12 = scmp.ne.s32.totalorder %s1937_s1, %s1350_s29 }
  0x15   : > { %p1357_p5 = scmp.lt.u32.totalorder %s1350_s29, %s1937_s1 }
  0x16   : > { %p1352_p13 = pneg %p1596_p11 }
  0x18   : > { %p1353_p0 = pnand %p1352_p13, %p1351_p12 }
  0x1a   : > { %p1354_p3 = pneg %p1353_p0 }
  0x1c   : > { %p1359_p7 = pnand %p1357_p5, %p1354_p3 }
  0x1e   : > { %1362 = shalt.err (!%p1359_p7)
}
  0x1f   : > { %s1363_s7 = scalar_lea.vmem %s1589_s22, 384  ;;  %p1371_p2 = scmp.lt.s32.totalorder %s1589_s22, %s1589_s22 }
  0x20   : > { %p1364_p9 = scmp.ne.s32.totalorder %s1589_s22, %s1363_s7  ;;  %p1372_p6 = scmp.lt.s32.totalorder %s1363_s7, %s1363_s7 }
  0x22   : > { %p1366_p10 = pnand %p1364_p9, %p1352_p13  ;;  %p1373_p4 = por %p1372_p6, %p1371_p2 }
  0x24   : > { %p1367_p1 = pneg %p1366_p10 }
  0x26   : > { %p1374_p8 = pnand %p1373_p4, %p1367_p1 }
  0x28   : > { %1377 = shalt.err (!%p1374_p8)
}
  0x29   : > { %s1513_s8 = smov 64   ;;  %s1514_s9 = smov 4  }
  0x2a   : > { %1257 = dma.hbm_to_vmem [thread:$0]  (!%p1596_p11), %s1937_s1, 384, %s1589_s22, [#allocation7], %s1513_s8, %s1513_s8, %s1514_s9  }
  0x2b   : > { %p29_p2 = scmp.eq.s32.totalorder %s28_s26, 0  ;;  %p38_p1 = scmp.ne.s32.totalorder %s1506_s14, %s1502_s13 }
  0x2c   : > { %p39_p4 = scmp.eq.s32.totalorder %s1510_s15, 0  ;;  %p1270_p6 = scmp.lt.s32.totalorder %s1510_s15, 2 }
  0x2d   : > { %s1632_s17 = scalar_select %p29_p2, %s1506_s14, %s31_s25  }
  0x2e   : > { %p40_p8 = por %p39_p4, %p38_p1  ;;  %p1947_p10 = scmp.eq.s32.totalorder %s1566_s16, 1 }
  0x2f   : > { %s154_s27 = sand.u32 1, %s1506_s14   ;;  %s1144_s28 = sshll.u32 %s1510_s15, 11 }
  0x30   : > { %p1636_p12 = por %p1947_p10, %p38_p1  ;;  %s1094_s29 = sshll.u32 %s154_s27, 7 }
  0x31   : > { %s1645_s4 = scalar_lea.hbm %s1936_s0, %s1144_s28  ;;  %s158_s22 = scalar_lea.vmem [#allocation3], %s1094_s29 }
  0x32   : > { %s165_s25 = sshll.u32 %s158_s22, 4  ;;  %p1647_p11 = pnand %p1270_p6, %p40_p8  ;;  %s1651_s25 = int_to_ptr.vmem [resolvable:$true] %s165_s25 }
  0x33   : > { %s1653_s5 = scalar_lea.sflag [#allocation4], %s154_s27  ;;  %s1378_s6 = scalar_lea.hbm %s1645_s4, 2048 }
  0x34   : > { %p1379_p13 = scmp.ne.s32.totalorder %s1645_s4, %s1378_s6  ;;  %p1380_p0 = pneg %p1647_p11 }
  0x35   : > { %s1383_s9 = scalar_lea.hbm %s1936_s0, 4096  ;;  %p1384_p7 = scmp.lt.u32.totalorder %s1645_s4, %s1936_s0 }
  0x36   : > { %p1381_p3 = pnand %p1380_p0, %p1379_p13  ;;  %p1385_p9 = scmp.lt.u32.totalorder %s1383_s9, %s1378_s6 }
  0x37   : > { %p1387_p1 = scmp.lt.u32.totalorder %s1378_s6, %s1645_s4 }
  0x38   : > { %p1382_p5 = pneg %p1381_p3  ;;  %p1386_p2 = por %p1385_p9, %p1384_p7 }
  0x3a   : > { %p1388_p4 = por %p1387_p1, %p1386_p2 }
  0x3c   : > { %p1389_p6 = pnand %p1388_p4, %p1382_p5 }
  0x3e   : > { %1392 = shalt.err (!%p1389_p6)
}
  0x3f   : > { %s1393_s27 = scalar_lea.vmem %s1651_s25, 2048  ;;  %s1515_s28 = smov [#allocation3]  }
  0x40   : > { %p1394_p8 = scmp.ne.s32.totalorder %s1651_s25, %s1393_s27  ;;  %s1398_s29 = sshll.u32 %s1515_s28, 4  ;;  %s1399_s29 = int_to_ptr.vmem [resolvable:$false] %s1398_s29 }
  0x41   : > { %s1400_s23 = scalar_lea.vmem %s1399_s29, 4096  ;;  %p1401_p3 = scmp.lt.s32.totalorder %s1651_s25, %s1399_s29 }
  0x42   : > { %p1396_p10 = pnand %p1394_p8, %p1380_p0  ;;  %p1402_p7 = scmp.lt.s32.totalorder %s1400_s23, %s1393_s27 }
  0x44   : > { %p1397_p13 = pneg %p1396_p10  ;;  %p1403_p9 = por %p1402_p7, %p1401_p3 }
  0x46   : > { %p1404_p2 = pnand %p1403_p9, %p1397_p13 }
  0x48   : > { %1407 = shalt.err (!%p1404_p2)
}
  0x49   : > { %s1516_s30 = smov 128   ;;  %s1517_s22 = smov 8  }
  0x4a   : > { %1261 = dma.hbm_to_vmem [thread:$0]  (!%p1647_p11), %s1645_s4, 2048, %s1651_s25, %s1653_s5, %s1516_s30, %s1516_s30, %s1517_s22  }
  0x4b   : > { %p1950_p0 = scmp.ne.s32.totalorder %s1945_s20, 0 }
  0x4c   : > { %s1684_s6 = sand.u32 (!%p1950_p0), 1, %s1502_s13   ;;  %p1951_p5 = scmp.ne.s32.totalorder (!%p1950_p0), %s1943_s18, 0 }
  0x4d   : > { %177 = sbr.rel (%p1950_p0) target bundleno = 642 (0x282), region = 28  ;;  %s1098_s7 = sshll.u32 (!%p1950_p0), %s1684_s6, 7 }
  0x4e   : > { %s180_s8 = scalar_lea.sflag (!%p1950_p0), [#allocation4], %s1684_s6  ;;  %s183_s9 = scalar_lea.vmem (!%p1950_p0), [#allocation3], %s1098_s7 }
  0x54   : > { %1481 = dma.done.wait (%p1951_p5), %s180_s8, 2048  }
  0x55   : > { %1483 = vsyncadd (%p1951_p5), %s180_s8, 4294965248  ;;  %p1952_p1 = scmp.eq.s32.totalorder %s1566_s16, 0 }
  0x57   : > { %1485 = dma.done.wait (%p1952_p1), [#allocation7], 384   ;;  %p1953_p11 = pmov %p1952_p1 }
  0x58   : > { %v216_v0 = vld [vmem:[%s183_s9] sm:$0xff]  ;;  %v217_v1 = vld [vmem:[%s183_s9 + $0x8] sm:$0xff]  ;;  %v218_v2 = vld [vmem:[%s183_s9 + $0x10] sm:$0xff]  ;;  %s1518_s18 = smov 124   ;;  %s1519_s20 = smov 4   ;;  %vm391_vm0 = vcmask 1043456  }
  0x59   : > { %1487 = vsyncadd (%p1953_p11), [#allocation7], 4294966912  ;;  %v219_v3 = vld [vmem:[%s183_s9 + $0x18] sm:$0xff]  ;;  %v232_v4 = vmax.f32 %v216_v0, %v217_v1  ;;  %v220_v5 = vld [vmem:[%s183_s9 + $0x20] sm:$0xff]  ;;  %vm392_vm1 = vsmask.f32 3328 }
  0x5a   : > { %v221_v6 = vld [vmem:[%s183_s9 + $0x28] sm:$0xff]  ;;  %v233_v7 = vmax.f32 %v218_v2, %v219_v3  ;;  %v222_v8 = vld [vmem:[%s183_s9 + $0x30] sm:$0xff]  ;;  %v223_v9 = vld [vmem:[%s183_s9 + $0x38] sm:$0xff]  ;;  %s1520_s4 = smov 8   ;;  %vm288_vm3 = vcmask 93184   ;;  %vm568_vm4 = vcmask 1045504  }
  0x5b   : > { %v234_v10 = vmax.f32 %v220_v5, %v221_v6  ;;  %v224_v11 = vld [vmem:[%s183_s9 + $0x40] sm:$0xff]  ;;  %v235_v12 = vmax.f32 %v222_v8, %v223_v9  ;;  %v225_v13 = vld [vmem:[%s183_s9 + $0x48] sm:$0xff]  ;;  %v226_v14 = vld [vmem:[%s183_s9 + $0x50] sm:$0xff]  ;;  %vm356_vm5 = vcmask 1040384   ;;  %vm357_vm6 = vsmask.f32 256 }
  0x5c   : > { %v227_v15 = vld [vmem:[%s183_s9 + $0x58] sm:$0xff]  ;;  %v1315_v16 = vpack.i.bf16 %v233_v7, %v232_v4  ;;  %v236_v17 = vmax.f32 %v224_v11, %v225_v13  ;;  %v228_v19 = vld [vmem:[%s183_s9 + $0x60] sm:$0xff]  ;;  %v229_v20 = vld [vmem:[%s183_s9 + $0x68] sm:$0xff]  ;;  %vm450_vm8 = vcmask 31744   ;;  %vm475_vm9 = vcmask 64512   ;;  %s1100_s25 = sshll.u32 %s1684_s6, 5 }
  0x5d   : > { %v237_v18 = vmax.f32 %v226_v14, %v227_v15  ;;  %v230_v21 = vld [vmem:[%s183_s9 + $0x70] sm:$0xff]  ;;  %v231_v22 = vld [vmem:[%s183_s9 + $0x78] sm:$0xff]  ;;  %v238_v23 = vmax.f32 %v228_v19, %v229_v20  ;;  %v1320_v24 = vpack.i.bf16 %v235_v12, %v234_v10  ;;  %vm1725_vm2 = vmand %vm391_vm0, %vm392_vm1  ;;  %vm555_vm10 = vcmask 97280   ;;  %s1847_s26 = scalar_lea.vmem [#allocation8], %s1100_s25  ;;  %s1153_s10 = sshll.u32 %s1566_s16, 9 }
  0x5e   : > { %1316 = vrot.lane.b32.xlu0 %v1315_v16, %s1518_s18  ;;  %v239_v26 = vmax.f32 %v230_v21, %v231_v22  ;;  %vm1780_vm7 = vmand %vm356_vm5, %vm357_vm6  ;;  %s962_s5 = sshll.u32 %s1847_s26, 4  ;;  %s1858_s28 = scalar_lea.hbm %s1938_s2, %s1153_s10  ;;  %s1853_s5 = int_to_ptr.vmem [resolvable:$true] %s962_s5 }
  0x5f   : > { %v1325_v25 = vpack.i.bf16 %v237_v18, %v236_v17  ;;  %s944_s29 = scalar_lea.sflag [#allocation5], %s1684_s6  ;;  %s1408_s23 = scalar_lea.vmem %s1853_s5, 512 }
  0x60   : > { %v1330_v27 = vpack.i.bf16 %v239_v26, %v238_v23  ;;  %p1409_p4 = scmp.ne.s32.totalorder %s1853_s5, %s1408_s23  ;;  %s1522_s30 = smov [#allocation8]  }
  0x61   : > { %1326 = vrot.lane.b32.xlu1 %v1325_v25, %s1518_s18  ;;  %s1412_s22 = sshll.u32 %s1522_s30, 4  ;;  %s1413_s22 = int_to_ptr.vmem [resolvable:$false] %s1412_s22 }
  0x62   : > { %1321 = vrot.lane.b32.xlu0 %v1320_v24, %s1518_s18  ;;  %p1410_p6 = pnand %p1409_p4, %p1636_p12  ;;  %s1414_s7 = scalar_lea.vmem %s1413_s22, 1024 }
  0x63   : > { %p1415_p10 = scmp.lt.s32.totalorder %s1853_s5, %s1413_s22  ;;  %p1416_p13 = scmp.lt.s32.totalorder %s1414_s7, %s1408_s23 }
  0x64   : > { %p1411_p8 = pneg %p1410_p6 }
  0x65   : > { %1331 = vrot.lane.b32.xlu1 %v1330_v27, %s1518_s18  ;;  %p1417_p3 = por %p1416_p13, %p1415_p10 }
  0x67   : > { %p1418_p7 = pnand %p1417_p3, %p1411_p8 }
  0xd0   : > { %v1317_v28 = vpop.permute.xlu0 %1316 }
  0xd1   : > { %v1319_v29 = vunpack.i.h.bf16 %v1317_v28  ;;  %v1318_v30 = vunpack.i.l.bf16 %v1317_v28 }
  0xd3   : > { %v1327_v31 = vpop.permute.xlu1 %1326  ;;  %v273_v32 = vmax.f32 %v233_v7, %v1319_v29  ;;  %v272_v33 = vmax.f32 %v232_v4, %v1318_v30 }
  0xd4   : > { %v1329_v34 = vunpack.i.h.bf16 %v1327_v31  ;;  %v1328_v35 = vunpack.i.l.bf16 %v1327_v31  ;;  %v1322_v36 = vpop.permute.xlu0 %1321 }
  0xd5   : > { %v1324_v37 = vunpack.i.h.bf16 %v1322_v36  ;;  %v1323_v38 = vunpack.i.l.bf16 %v1322_v36  ;;  %v281_v41 = vpack.c.bf16 %v273_v32, %v273_v32  ;;  %v280_v42 = vpack.c.bf16 %v272_v33, %v272_v33  ;;  %v1336_v36 = vld [vmem:[#allocation6] sm:$0x3f]  }
  0xd6   : > { %v277_v39 = vmax.f32 %v237_v18, %v1329_v34  ;;  %v276_v40 = vmax.f32 %v236_v17, %v1328_v35  ;;  %v1335_v35 = vld [vmem:[#allocation6 + $0x8] sm:$0x3f]   ;;  %1241 = vmatprep.subr.msk.bf16.mxu0 %vm568_vm4, %v1336_v36 }
  0xd7   : > { %v1332_v43 = vpop.permute.xlu1 %1331  ;;  %v275_v44 = vmax.f32 %v235_v12, %v1324_v37  ;;  %v274_v45 = vmax.f32 %v234_v10, %v1323_v38  ;;  %412 = vrot.lane.b32.xlu1 %v281_v41, %s1519_s20  ;;  %410 = vrot.lane.b32.xlu0 %v280_v42, %s1519_s20  ;;  %v300_v54 = vshrl.u32 %v281_v41, 16  ;;  %v303_v55 = vshll.u32 %v281_v41, 16 }
  0xd8   : > { %v1334_v46 = vunpack.i.h.bf16 %v1332_v43  ;;  %v1333_v47 = vunpack.i.l.bf16 %v1332_v43  ;;  %v1698_v52 = vpack.c.bf16 %v277_v39, %v277_v39  ;;  %v1700_v53 = vpack.c.bf16 %v276_v40, %v276_v40  ;;  %v1339_v39 = vld [vmem:[#allocation6 + $0x10] sm:$0x3f]   ;;  %1240 = vmatprep.subr.msk.bf16.mxu1 %vm568_vm4, %v1335_v35 }
  0xd9   : > { %v283_v49 = vpack.c.bf16 %v275_v44, %v275_v44  ;;  %v282_v50 = vpack.c.bf16 %v274_v45, %v274_v45  ;;  %v296_v56 = vshll.u32 %v280_v42, 16  ;;  %v293_v58 = vshrl.u32 %v280_v42, 16 }
  0xda   : > { %v279_v48 = vmax.f32 %v239_v26, %v1334_v46  ;;  %v278_v51 = vmax.f32 %v238_v23, %v1333_v47  ;;  %v328_v0 = vshrl.u32 %v1698_v52, 16  ;;  %v369_v1 = vrot.slane %v303_v55, 1 }
  0xdb   : > { %416 = vrot.lane.b32.xlu1 %v283_v49, %s1519_s20  ;;  %414 = vrot.lane.b32.xlu0 %v282_v50, %s1519_s20  ;;  %v317_v59 = vshll.u32 %v283_v49, 16  ;;  %v314_v60 = vshrl.u32 %v283_v49, 16  ;;  %v310_v61 = vshll.u32 %v282_v50, 16  ;;  %v307_v63 = vshrl.u32 %v282_v50, 16 }
  0xdc   : > { %v1704_v57 = vpack.c.bf16 %v279_v48, %v279_v48  ;;  %v1706_v62 = vpack.c.bf16 %v278_v51, %v278_v51  ;;  %v302_v2 = vrot.slane %v300_v54, 7  ;;  %v367_v3 = vrot.slane %v296_v56, 1 }
  0xdd   : > { %v321_v4 = vshrl.u32 %v1700_v53, 16  ;;  %v295_v5 = vrot.slane %v293_v58, 7  ;;  %v373_v6 = vrot.slane %v317_v59, 1  ;;  %v316_v8 = vrot.slane %v314_v60, 7 }
  0xde   : > { %v342_v7 = vshrl.u32 %v1704_v57, 16  ;;  %v371_v9 = vrot.slane %v310_v61, 1  ;;  %v331_v10 = vshll.u32 %v1698_v52, 16  ;;  %v309_v11 = vrot.slane %v307_v63, 7 }
  0xdf   : > { %420 = vrot.lane.b32.xlu1 %v1698_v52, %s1519_s20  ;;  %418 = vrot.lane.b32.xlu0 %v1700_v53, %s1519_s20  ;;  %v330_v12 = vrot.slane %v328_v0, 7  ;;  %v324_v13 = vshll.u32 %v1700_v53, 16  ;;  %v335_v14 = vshrl.u32 %v1706_v62, 16  ;;  %v370_v15 = vor.u32 %v369_v1, %v300_v54 }
  0xe0   : > { %v368_v16 = vor.u32 %v367_v3, %v293_v58  ;;  %v323_v17 = vrot.slane %v321_v4, 7  ;;  %v1718_v18 = vor.u32 %v303_v55, %v302_v2  ;;  %v374_v20 = vor.u32 %v373_v6, %v314_v60 }
  0xe1   : > { %v344_v21 = vrot.slane %v342_v7, 7  ;;  %v337_v22 = vrot.slane %v335_v14, 7  ;;  %v1731_v23 = vor.u32 %v296_v56, %v295_v5  ;;  %v372_v24 = vor.u32 %v371_v9, %v307_v63 }
  0xe2   : > { %v377_v25 = vrot.slane %v331_v10, 1  ;;  %v345_v26 = vshll.u32 %v1704_v57, 16  ;;  %v1734_v27 = vor.u32 %v317_v59, %v316_v8  ;;  %v375_v28 = vrot.slane %v324_v13, 1 }
  0xe3   : > { %424 = vrot.lane.b32.xlu1 %v1704_v57, %s1519_s20  ;;  %422 = vrot.lane.b32.xlu0 %v1706_v62, %s1519_s20  ;;  %v338_v29 = vshll.u32 %v1706_v62, 16  ;;  %v1737_v30 = vor.u32 %v310_v61, %v309_v11  ;;  %v1739_v31 = vor.u32 %v331_v10, %v330_v12  ;;  %v395_v32 = vsel %vm1725_vm2, %v370_v15, 0 }
  0xe4   : > { %v394_v33 = vsel %vm1725_vm2, %v368_v16, 0  ;;  %v1745_v34 = vor.u32 %v324_v13, %v323_v17  ;;  %v1749_v37 = vor.u32 %v345_v26, %v344_v21  ;;  %v397_v40 = vsel %vm1725_vm2, %v374_v20, 0 }
  0xe5   : > { %v1751_v38 = vor.u32 %v338_v29, %v337_v22  ;;  %v396_v41 = vsel %vm1725_vm2, %v372_v24, 0  ;;  %v378_v42 = vor.u32 %v377_v25, %v328_v0  ;;  %v376_v43 = vor.u32 %v375_v28, %v321_v4 }
  0xe6   : > { %v381_v44 = vrot.slane %v345_v26, 1  ;;  %v379_v45 = vrot.slane %v338_v29, 1  ;;  %v570_v46 = vsel %vm568_vm4, %v1335_v35, 0  ;;  %v1757_v47 = vsel %vm568_vm4, %v1336_v36, 0 }
  0xe7   : > { %436 = vrot.lane.b32.xlu1 %v395_v32, %s1520_s4  ;;  %434 = vrot.lane.b32.xlu0 %v394_v33, %s1520_s4  ;;  %v1759_v48 = vsel %vm568_vm4, %v1339_v39, 0  ;;  %v1521_v49 = vmov 0   ;;  %v399_v50 = vsel %vm1725_vm2, %v378_v42, 0  ;;  %v398_v51 = vsel %vm1725_vm2, %v376_v43, 0 }
  0xe8   : > { %289 = vst.msk [vmem:[#allocation2] sm:$0xf] %vm288_vm3, %v1521_v49  ;;  %291 = vst.msk [vmem:[#allocation2 + $0x24] sm:$0xf] %vm288_vm3, %v1521_v49  ;;  %1193 = vmatpush3.bf16.msra.mxu1 %v570_v46  ;;  %1203 = vmatpush3.bf16.msra.mxu0 %v1757_v47  ;;  %v382_v52 = vor.u32 %v381_v44, %v342_v7  ;;  %v380_v53 = vor.u32 %v379_v45, %v335_v14  ;;  %v360_v1 = vsel %vm1780_vm7, 0, %v1718_v18 }
  0xe9   : > { %1242 = vmatprep.subr.msk.bf16.mxu1 %vm568_vm4, %v1336_v36  ;;  %1243 = vmatprep.subr.msk.bf16.mxu0 %vm568_vm4, %v1339_v39  ;;  %v359_v2 = vsel %vm1780_vm7, 0, %v1731_v23  ;;  %v362_v9 = vsel %vm1780_vm7, 0, %v1734_v27  ;;  %v361_v10 = vsel %vm1780_vm7, 0, %v1737_v30  ;;  %v364_v17 = vsel %vm1780_vm7, 0, %v1739_v31 }
  0xea   : > { %v401_v54 = vsel %vm1725_vm2, %v382_v52, 0  ;;  %v400_v55 = vsel %vm1725_vm2, %v380_v53, 0  ;;  %v363_v18 = vsel %vm1780_vm7, 0, %v1745_v34  ;;  %v366_v27 = vsel %vm1780_vm7, 0, %v1749_v37 }
  0xeb   : > { %440 = vrot.lane.b32.xlu1 %v397_v40, %s1520_s4  ;;  %438 = vrot.lane.b32.xlu0 %v396_v41, %s1520_s4  ;;  %v365_v28 = vsel %vm1780_vm7, 0, %v1751_v38 }
  0xef   : > { %444 = vrot.lane.b32.xlu1 %v399_v50, %s1520_s4  ;;  %442 = vrot.lane.b32.xlu0 %v398_v51, %s1520_s4 }
  0xf3   : > { %448 = vrot.lane.b32.xlu1 %v401_v54, %s1520_s4  ;;  %446 = vrot.lane.b32.xlu0 %v400_v55, %s1520_s4 }
 0x149   : > { %v413_v56 = vpop.permute.xlu1 %412  ;;  %v411_v58 = vpop.permute.xlu0 %410 }
 0x14a   : > { %v456_v3 = vsel %vm450_vm8, %v360_v1, %v413_v56  ;;  %v453_v4 = vsel %vm450_vm8, %v359_v2, %v411_v58 }
 0x14d   : > { %v417_v59 = vpop.permute.xlu1 %416  ;;  %v415_v57 = vpop.permute.xlu0 %414 }
 0x14e   : > { %v462_v11 = vsel %vm450_vm8, %v362_v9, %v417_v59  ;;  %v459_v12 = vsel %vm450_vm8, %v361_v10, %v415_v57 }
 0x151   : > { %v421_v60 = vpop.permute.xlu1 %420  ;;  %v419_v61 = vpop.permute.xlu0 %418 }
 0x152   : > { %v468_v19 = vsel %vm450_vm8, %v364_v17, %v421_v60  ;;  %v465_v20 = vsel %vm450_vm8, %v363_v18, %v419_v61 }
 0x155   : > { %v425_v63 = vpop.permute.xlu1 %424  ;;  %v423_v0 = vpop.permute.xlu0 %422 }
 0x156   : > { %v474_v29 = vsel %vm450_vm8, %v366_v27, %v425_v63  ;;  %v471_v30 = vsel %vm450_vm8, %v365_v28, %v423_v0 }
 0x159   : > { %v437_v5 = vpop.permute.xlu1 %436  ;;  %v435_v6 = vpop.permute.xlu0 %434 }
 0x15a   : > { %v480_v7 = vsel %vm475_vm9, %v456_v3, %v437_v5  ;;  %v477_v8 = vsel %vm475_vm9, %v453_v4, %v435_v6 }
 0x15b   : > { %502 = vst.msk [vmem:[#allocation2 + $0x8] sm:$0xf] %vm288_vm3, %v480_v7  ;;  %501 = vst.msk [vmem:[#allocation2 + $0x4] sm:$0xf] %vm288_vm3, %v477_v8 }
 0x15d   : > { %v441_v13 = vpop.permute.xlu1 %440  ;;  %v439_v14 = vpop.permute.xlu0 %438 }
 0x15e   : > { %v486_v15 = vsel %vm475_vm9, %v462_v11, %v441_v13  ;;  %v483_v16 = vsel %vm475_vm9, %v459_v12, %v439_v14 }
 0x15f   : > { %504 = vst.msk [vmem:[#allocation2 + $0x10] sm:$0xf] %vm288_vm3, %v486_v15  ;;  %503 = vst.msk [vmem:[#allocation2 + $0xc] sm:$0xf] %vm288_vm3, %v483_v16 }
 0x161   : > { %v445_v21 = vpop.permute.xlu1 %444  ;;  %v443_v22 = vpop.permute.xlu0 %442 }
 0x162   : > { %v492_v23 = vsel %vm475_vm9, %v468_v19, %v445_v21  ;;  %v489_v24 = vsel %vm475_vm9, %v465_v20, %v443_v22  ;;  %v1337_v25 = vld [vmem:[#allocation2 + $0x4] sm:$0xff]  }
 0x163   : > { %506 = vst.msk [vmem:[#allocation2 + $0x18] sm:$0xf] %vm288_vm3, %v492_v23  ;;  %505 = vst.msk [vmem:[#allocation2 + $0x14] sm:$0xf] %vm288_vm3, %v489_v24  ;;  %v1338_v26 = vld [vmem:[#allocation2] sm:$0xff]   ;;  %1194 = vmatprep.mubr.msk.bf16.mxu1 %vm555_vm10, %v1337_v25 }
 0x164   : > { %1204 = vmatprep.mubr.msk.bf16.mxu0 %vm555_vm10, %v1338_v26 }
 0x165   : > { %v449_v31 = vpop.permute.xlu1 %448  ;;  %v447_v32 = vpop.permute.xlu0 %446 }
 0x166   : > { %v498_v33 = vsel %vm475_vm9, %v474_v29, %v449_v31  ;;  %v495_v34 = vsel %vm475_vm9, %v471_v30, %v447_v32  ;;  %v1340_v35 = vld [vmem:[#allocation2 + $0xc] sm:$0xff]  }
 0x167   : > { %508 = vst.msk [vmem:[#allocation2 + $0x20] sm:$0xf] %vm288_vm3, %v498_v33  ;;  %507 = vst.msk [vmem:[#allocation2 + $0x1c] sm:$0xf] %vm288_vm3, %v495_v34  ;;  %v1341_v36 = vld [vmem:[#allocation2 + $0x8] sm:$0xff]   ;;  %1195 = vmatmul.mubr.msk.bf16.vlgmr.msra.gmra.mrb[0].mxu1 %vm555_vm10, %v1340_v35 }
 0x168   : > { %v1342_v37 = vld [vmem:[#allocation2 + $0x8] sm:$0xff]   ;;  %1223 = vmatpush3.bf16.msra.mxu1 %v1757_v47  ;;  %1205 = vmatmul.mubr.msk.bf16.vlgmr.msra.gmra.mrb[0].mxu0 %vm555_vm10, %v1341_v36 }
 0x169   : > { %1213 = vmatpush3.bf16.msra.mxu0 %v1759_v48  ;;  %1214 = vmatprep.mubr.msk.bf16.mxu0 %vm555_vm10, %v1342_v37 }
 0x16a   : > { %v1343_v38 = vld [vmem:[#allocation2 + $0x14] sm:$0xff]  }
 0x16b   : > { %1198 = vmatprep.mubr.msk.bf16.mxu1 %vm555_vm10, %v1343_v38  ;;  %v1345_v40 = vld [vmem:[#allocation2 + $0x10] sm:$0xff]  }
 0x16c   : > { %v1346_v41 = vld [vmem:[#allocation2 + $0x10] sm:$0xff]  }
 0x16e   : > { %v1344_v39 = vld [vmem:[#allocation2 + $0x1c] sm:$0xff]  }
 0x16f   : > { %1199 = vmatmul.mubr.msk.bf16.gmra.mrb[4].mxu1 %vm555_vm10, %v1344_v39  ;;  %v1347_v42 = vld [vmem:[#allocation2 + $0x18] sm:$0xff]   ;;  %v1349_v44 = vld [vmem:[#allocation2 + $0x20] sm:$0xff]  }
 0x170   : > { %1208 = vmatprep.mubr.msk.bf16.mxu1 %vm555_vm10, %v1345_v40  ;;  %v1348_v43 = vld [vmem:[#allocation2 + $0x18] sm:$0xff]  }
 0x174   : > { %1215 = vmatmul.mubr.msk.bf16.vlgmr.msra.gmra.mrb[0].mxu0 %vm555_vm10, %v1346_v41 }
 0x175   : > { %1218 = vmatprep.mubr.msk.bf16.mxu0 %vm555_vm10, %v1347_v42 }
 0x17b   : > { %1209 = vmatmul.mubr.msk.bf16.vlgmr.msra.gmra.mrb[4].mxu1 %vm555_vm10, %v1348_v43 }
 0x17c   : > { %1219 = vmatmul.mubr.msk.bf16.gmra.mrb[4].mxu0 %vm555_vm10, %v1349_v44 }
 0x23a   : > { %v1196_v45 = vpop.f32.mrb[0].mxu1 }
 0x23b   : > { %v606_v46 = vpop.f32.mrb[1].mxu1 }
 0x23c   : > { %v1197_v47 = vpop.f32.mrb[2].mxu1 }
 0x23d   : > { %v609_v48 = vpop.f32.mrb[3].mxu1 }
 0x247   : > { %v1216_v49 = vpop.f32.mrb[0].mxu0 }
 0x248   : > { %v1224_v50 = vadd.f32 %v1216_v49, %v1196_v45  ;;  %v828_v51 = vpop.f32.mrb[1].mxu0 }
 0x249   : > { %v1225_v52 = vadd.f32 %v828_v51, %v606_v46  ;;  %v1217_v53 = vpop.f32.mrb[2].mxu0 }
 0x24a   : > { %v1226_v54 = vadd.f32 %v1217_v53, %v1197_v47  ;;  %v831_v55 = vpop.f32.mrb[3].mxu0  ;;  %v923_v63 = vmul.f32 %v1224_v50, %v1224_v50 }
 0x24b   : > { %v1227_v56 = vadd.f32 %v831_v55, %v609_v48  ;;  %v921_v59 = vmul.f32 %v1225_v52, %v1225_v52 }
 0x24c   : > { %v1162_v58 = vpack.c.bf16 %v1226_v54, %v1224_v50  ;;  %v924_v7 = vmul.f32 %v1226_v54, %v1226_v54 }
 0x24d   : > { %v1157_v57 = vpack.c.bf16 %v1227_v56, %v1225_v52  ;;  %v907_v60 = vadd.f32 %v1227_v56, %v1225_v52  ;;  %v922_v61 = vmul.f32 %v1227_v56, %v1227_v56 }
 0x24e   : > { %1174 = vst [vmem:[%s1847_s26 + $0x8] sm:$0xff] %v1162_v58   ;;  %v1210_v62 = vpop.f32.mrb[4].mxu1 }
 0x24f   : > { %1158 = vst [vmem:[%s1847_s26] sm:$0xff] %v1157_v57   ;;  %v908_v0 = vadd.f32 %v1224_v50, %v907_v60  ;;  %v929_v1 = vadd.f32 %v922_v61, %v921_v59  ;;  %v1220_v2 = vpop.f32.mrb[4].mxu0  ;;  %v727_v3 = vpop.f32.mrb[5].mxu1 }
 0x250   : > { %v1228_v4 = vadd.f32 %v1220_v2, %v1210_v62  ;;  %v844_v5 = vpop.f32.mrb[5].mxu0  ;;  %v1211_v6 = vpop.f32.mrb[6].mxu1 }
 0x251   : > { %v930_v8 = vadd.f32 %v929_v1, %v923_v63  ;;  %v1229_v9 = vadd.f32 %v844_v5, %v727_v3  ;;  %v909_v10 = vadd.f32 %v1226_v54, %v908_v0  ;;  %v1221_v11 = vpop.f32.mrb[6].mxu0  ;;  %v730_v12 = vpop.f32.mrb[7].mxu1 }
 0x252   : > { %v1230_v13 = vadd.f32 %v1221_v11, %v1211_v6  ;;  %v847_v14 = vpop.f32.mrb[7].mxu0  ;;  %v927_v24 = vmul.f32 %v1228_v4, %v1228_v4 }
 0x253   : > { %v910_v15 = vadd.f32 %v1229_v9, %v909_v10  ;;  %v925_v16 = vmul.f32 %v1229_v9, %v1229_v9  ;;  %v931_v17 = vadd.f32 %v930_v8, %v924_v7  ;;  %v1231_v18 = vadd.f32 %v847_v14, %v730_v12 }
 0x254   : > { %v1172_v19 = vpack.c.bf16 %v1230_v13, %v1228_v4 }
 0x255   : > { %v932_v20 = vadd.f32 %v931_v17, %v925_v16  ;;  %v1167_v21 = vpack.c.bf16 %v1231_v18, %v1229_v9  ;;  %v911_v22 = vadd.f32 %v1231_v18, %v910_v15  ;;  %v926_v23 = vmul.f32 %v1231_v18, %v1231_v18 }
 0x256   : > { %1176 = vst [vmem:[%s1847_s26 + $0x18] sm:$0xff] %v1172_v19  }
 0x257   : > { %1175 = vst [vmem:[%s1847_s26 + $0x10] sm:$0xff] %v1167_v21   ;;  %v912_v25 = vadd.f32 %v1228_v4, %v911_v22  ;;  %v933_v26 = vadd.f32 %v932_v20, %v926_v23 }
 0x258   : > { %1421 = shalt.err (!%p1418_p7)
}
 0x259   : > { %s1422_s8 = scalar_lea.hbm %s1858_s28, 512  ;;  %s1426_s4 = scalar_lea.hbm %s1938_s2, 1024 }
 0x25a   : > { %p1423_p9 = scmp.ne.s32.totalorder %s1858_s28, %s1422_s8  ;;  %p1427_p5 = scmp.lt.u32.totalorder %s1858_s28, %s1938_s2 }
 0x25b   : > { %p1428_p1 = scmp.lt.u32.totalorder %s1426_s4, %s1422_s8  ;;  %p1430_p4 = scmp.lt.u32.totalorder %s1422_s8, %s1858_s28 }
 0x25c   : > { %p1424_p2 = pnand %p1423_p9, %p1636_p12 }
 0x25d   : > { %p1429_p11 = por %p1428_p1, %p1427_p5 }
 0x25e   : > { %p1425_p0 = pneg %p1424_p2 }
 0x25f   : > { %p1431_p6 = por %p1430_p4, %p1429_p11 }
 0x261   : > { %p1432_p8 = pnand %p1431_p6, %p1425_p0 }
 0x263   : > { %1435 = shalt.err (!%p1432_p8)
}
 0x264   : > { %s1523_s10 = smov 64   ;;  %v928_v27 = vmul.f32 %v1230_v13, %v1230_v13  ;;  %v913_v28 = vadd.f32 %v1230_v13, %v912_v25  ;;  %v934_v29 = vadd.f32 %v933_v26, %v927_v24  ;;  %s1101_s11 = sshll.u32 %s1684_s6, 1 }
 0x265   : > { %1250 = dma.vmem_to_hbm [thread:$0]  (%p1636_p12), %s1853_s5, 512, %s1858_s28, %s944_s29, %s1523_s10, %s1523_s10, %s1519_s20  }
 0x266   : > { %v914_v30 = vrot.slane %v913_v28, 4  ;;  %v935_v31 = vadd.f32 %v934_v29, %v928_v27  ;;  %s1141_s27 = sshll.u32 %s1566_s16, 5  ;;  %s214_s23 = scalar_lea.vmem [#allocation9], %s1101_s11 }
 0x267   : > { %s978_s30 = sshll.u32 %s214_s23, 4  ;;  %s1892_s28 = scalar_lea.hbm %s1939_s3, %s1141_s27  ;;  %s1894_s30 = int_to_ptr.vmem [resolvable:$true] %s978_s30 }
 0x268   : > { %v915_v32 = vadd.f32 %v914_v30, %v913_v28  ;;  %v936_v33 = vrot.slane %v935_v31, 4  ;;  %s949_s29 = scalar_lea.sflag [#allocation10], %s1684_s6  ;;  %s1436_s22 = scalar_lea.vmem %s1894_s30, 32 }
 0x269   : > { %p1437_p10 = scmp.ne.s32.totalorder %s1894_s30, %s1436_s22  ;;  %s1524_s16 = smov [#allocation9]  }
 0x26a   : > { %v916_v34 = vrot.slane %v915_v32, 2  ;;  %v937_v35 = vadd.f32 %v936_v33, %v935_v31  ;;  %s1440_s7 = sshll.u32 %s1524_s16, 4  ;;  %s1441_s7 = int_to_ptr.vmem [resolvable:$false] %s1440_s7 }
 0x26b   : > { %p1438_p13 = pnand %p1437_p10, %p1636_p12  ;;  %s1442_s8 = scalar_lea.vmem %s1441_s7, 64 }
 0x26c   : > { %v917_v36 = vadd.f32 %v916_v34, %v915_v32  ;;  %v938_v37 = vrot.slane %v937_v35, 2  ;;  %p1443_p7 = scmp.lt.s32.totalorder %s1894_s30, %s1441_s7  ;;  %p1444_p9 = scmp.lt.s32.totalorder %s1442_s8, %s1436_s22 }
 0x26d   : > { %p1439_p3 = pneg %p1438_p13 }
 0x26e   : > { %v918_v38 = vrot.slane %v917_v36, 1  ;;  %v939_v39 = vadd.f32 %v938_v37, %v937_v35  ;;  %p1445_p2 = por %p1444_p9, %p1443_p7 }
 0x270   : > { %v919_v40 = vadd.f32 %v918_v38, %v917_v36  ;;  %v940_v41 = vrot.slane %v939_v39, 1  ;;  %p1446_p0 = pnand %p1445_p2, %p1439_p3 }
 0x272   : > { %920 = vst [vmem:[%s214_s23] sm:$0x1] %v919_v40  ;;  %v941_v42 = vadd.f32 %v940_v41, %v939_v39 }
 0x274   : > { %942 = vst [vmem:[%s214_s23 + $0x1] sm:$0x1] %v941_v42 }
 0x275   : > { %1449 = shalt.err (!%p1446_p0)
}
 0x276   : > { %s1450_s6 = scalar_lea.hbm %s1892_s28, 32  ;;  %s1454_s4 = scalar_lea.hbm %s1939_s3, 64 }
 0x277   : > { %p1451_p5 = scmp.ne.s32.totalorder %s1892_s28, %s1450_s6  ;;  %p1455_p4 = scmp.lt.u32.totalorder %s1892_s28, %s1939_s3 }
 0x278   : > { %p1456_p6 = scmp.lt.u32.totalorder %s1454_s4, %s1450_s6  ;;  %p1458_p10 = scmp.lt.u32.totalorder %s1450_s6, %s1892_s28 }
 0x279   : > { %p1452_p1 = pnand %p1451_p5, %p1636_p12 }
 0x27a   : > { %p1457_p8 = por %p1456_p6, %p1455_p4 }
 0x27b   : > { %p1453_p11 = pneg %p1452_p1 }
 0x27c   : > { %p1459_p13 = por %p1458_p10, %p1457_p8 }
 0x27e   : > { %p1460_p3 = pnand %p1459_p13, %p1453_p11 }
 0x280   : > { %1463 = shalt.err (!%p1460_p3)
}
 0x281   : > { %1251 = dma.vmem_to_hbm [thread:$0]  (%p1636_p12), %s1894_s30, 32, %s1892_s28, %s949_s29  }
 0x282 PF: > { %s990_s10 = sand.u32 1, %s1498_s12   ;;  %p1958_p7 = scmp.ne.s32.totalorder %s1944_s19, 0 }
 0x283   : > { %p1959_p9 = scmp.ge.s32.totalorder %s1510_s15, 2  ;;  %s991_s11 = scalar_lea.sflag [#allocation5], %s990_s10 }
 0x285   : > { %p1263_p2 = pnand %p1959_p9, %p1958_p7 }
 0x287   : > { %1489 = dma.done.wait (!%p1263_p2), %s991_s11, 512  }
 0x288   : > { %1491 = vsyncadd (!%p1263_p2), %s991_s11, 4294966784  ;;  %s1000_s27 = scalar_lea.sflag [#allocation10], %s990_s10 }
 0x289   : > { %1493 = dma.done.wait (!%p1263_p2), %s1000_s27, 32  }
 0x28a   : > { %1495 = vsyncadd (!%p1263_p2), %s1000_s27, 4294967264  ;;  %p21_p12 = scmp.ge.s32.totalorder %s1601_s24, 4   ;;  %s1960_s12 = smov %s1502_s13 }
 0x28b   : > { %s1961_s13 = smov %s1506_s14  ;;  %s1962_s14 = smov %s1632_s17 }
 0x28c   : > { %s1963_s15 = smov %s1601_s24  ;;  %23 = sbr.rel (!%p21_p12) target bundleno = 8 (0x8), region = 99 }
 0x293   :  { %1005 = vsyncpa [#allocation4], 1 }
 0x294   :  { %1007 = vsyncpa [#allocation4 + $0x1], 1 }
 0x295   :  { %1008 = vsyncpa [#allocation7], 1 }
 0x296   :  { %1009 = vsyncpa [#allocation5], 1 }
 0x297   :  { %1011 = vsyncpa [#allocation5 + $0x1], 1 }
 0x298   :  { %1012 = vsyncpa [#allocation10], 1 }
 0x299   :  { %1014 = vsyncpa [#allocation10 + $0x1], 1 }

// kernel: contracter_forward.4
= control target key start
LH: loop header
LB: loop body
LE: loop exit
PB: predicated region body
PF: predicated region fallthrough
CT: control target
= control target key end

     0   :  { %11 = vsyncpa [#allocation4], 0  ;;  %s3426_s0 = inlined_call_operand.hbm [shape: bf16[2,64,128], index: 0, kind: input, shape index: {}]   ;;  %s3427_s1 = inlined_call_operand.hbm [shape: f32[1,128], index: 1, kind: input, shape index: {}]   ;;  %s3428_s2 = inlined_call_operand.hbm [shape: f32[1,128], index: 2, kind: input, shape index: {}]   ;;  %s3429_s3 = inlined_call_operand.hbm [shape: bf16[3,384,128], index: 3, kind: input, shape index: {}]   ;;  %s3430_s4 = inlined_call_operand.hbm [shape: bf16[2,64,128], index: 4, kind: output, shape index: {0}]   ;;  %s3431_s5 = inlined_call_operand.hbm [shape: f32[2,2,128], index: 5, kind: output, shape index: {1}]  }
   0x1   :  { %13 = vsyncpa [#allocation4 + $0x1], 0 }
   0x2   :  { %14 = vsyncpa [#allocation7], 0 }
   0x3   :  { %15 = vsyncpa [#allocation10], 0 }
   0x4   :  { %16 = vsyncpa [#allocation5], 0 }
   0x5   :  { %18 = vsyncpa [#allocation5 + $0x1], 0 }
   0x6   :  { %19 = vsyncpa [#allocation13], 0 }
   0x7   :  { %21 = vsyncpa [#allocation13 + $0x1], 0  ;;  %s2968_s18 = smov 0   ;;  %s2970_s19 = smov 0  }
   0x8   :  { %s2972_s20 = smov 0   ;;  %s2974_s21 = smov 0  }
   0x9 LB: > { %s2989_s22 = sadd.s32 4294967295, %s2925_s21   ;;  %s2028_s23 = sadd.s32 4294967294, %s2925_s21   ;;  %s2925_s21 = sphi %s2974_s21, %s3458_s21   ;;  %s2921_s20 = sphi %s2972_s20, %s3457_s20   ;;  %s2917_s19 = sphi %s2970_s19, %s3456_s19   ;;  %s2913_s18 = sphi %s2968_s18, %s3455_s18  }
   0xa   : > { %p47_p0 = scmp.ne.s32.totalorder %s2917_s19, %s2913_s18  ;;  %p3432_p1 = scmp.eq.s32.totalorder %s2989_s22, 0 }
   0xb   : > { %p140_p3 = scmp.eq.s32.totalorder %s2028_s23, 1  ;;  %p2029_p5 = scmp.ge.s32.totalorder %s2925_s21, 1 }
   0xc   : > { %p2998_p4 = por %p3432_p1, %p47_p0  ;;  %p173_p7 = scmp.lt.s32.totalorder %s2925_s21, 3 }
   0xd   : > { %p3003_p6 = por %p140_p3, %p47_p0  ;;  %s2927_s27 = smov [#allocation6]  }
   0xe   : > { %s3435_s24 = scalar_select %p2998_p4, 1, 0 }
   0xf   : > { %s3436_s25 = scalar_select %p3003_p6, 1, 0 }
  0x10   : > { %p3008_p8 = pnand %p2029_p5, %p173_p7  ;;  %s186_s28 = sshll.u32 %s2927_s27, 4  ;;  %s187_s28 = int_to_ptr.vmem [resolvable:$true] %s186_s28 }
  0x11   : > { %s2928_s29 = smov [#allocation8]   ;;  %s2929_s7 = smov [#allocation9]  }
  0x12   : > { %s3437_s26 = scalar_select %p3008_p8, 1, 0 }
  0x13   : > { %p2543_p10 = pneg %p3008_p8  ;;  %s197_s30 = sshll.u32 %s2928_s29, 4  ;;  %s3021_s30 = int_to_ptr.vmem [resolvable:$true] %s197_s30 }
  0x14   : > { %s207_s8 = sshll.u32 %s2929_s7, 4  ;;  %s2705_s11 = scalar_lea.hbm %s3427_s1, 16  ;;  %s3023_s8 = int_to_ptr.vmem [resolvable:$true] %s207_s8 }
  0x15   : > { %p3017_p11 = pnand %p2543_p10, %p3432_p1  ;;  %p2706_p12 = scmp.ne.s32.totalorder %s3427_s1, %s2705_s11 }
  0x16   : > { %p2712_p5 = scmp.lt.u32.totalorder %s2705_s11, %s3427_s1 }
  0x17   : > { %p3033_p13 = pneg %p3017_p11 }
  0x19   : > { %p2708_p0 = pnand %p3033_p13, %p2706_p12 }
  0x1b   : > { %p2709_p3 = pneg %p2708_p0 }
  0x1d   : > { %p2714_p7 = pnand %p2712_p5, %p2709_p3 }
  0x1f   : > { %2717 = shalt.err (!%p2714_p7)
}
  0x20   : > { %s2718_s17 = scalar_lea.vmem %s187_s28, 16  ;;  %s2725_s23 = scalar_lea.vmem %s187_s28, 32 }
  0x21   : > { %p2719_p10 = scmp.ne.s32.totalorder %s187_s28, %s2718_s17  ;;  %p2726_p2 = scmp.lt.s32.totalorder %s187_s28, %s187_s28 }
  0x22   : > { %p2727_p6 = scmp.lt.s32.totalorder %s2725_s23, %s2718_s17 }
  0x23   : > { %p2721_p9 = pnand %p2719_p10, %p3033_p13 }
  0x24   : > { %p2728_p4 = por %p2727_p6, %p2726_p2 }
  0x25   : > { %p2722_p1 = pneg %p2721_p9 }
  0x27   : > { %p2729_p8 = pnand %p2728_p4, %p2722_p1 }
  0x29   : > { %2732 = shalt.err (!%p2729_p8)
}
  0x2a   : > { %2546 = dma.hbm_to_vmem [thread:$0]  (!%p3017_p11), %s3427_s1, 16, %s187_s28, [#allocation7]  }
  0x2b   : > { %s2733_s10 = scalar_lea.hbm %s3428_s2, 16 }
  0x2c   : > { %p2734_p9 = scmp.ne.s32.totalorder %s3428_s2, %s2733_s10  ;;  %p2740_p1 = scmp.lt.u32.totalorder %s2733_s10, %s3428_s2 }
  0x2e   : > { %p2736_p12 = pnand %p2734_p9, %p3033_p13 }
  0x30   : > { %p2737_p2 = pneg %p2736_p12 }
  0x32   : > { %p2742_p4 = pnand %p2740_p1, %p2737_p2 }
  0x34   : > { %2745 = shalt.err (!%p2742_p4)
}
  0x35   : > { %s2746_s28 = scalar_lea.vmem %s3021_s30, 16  ;;  %s2753_s16 = scalar_lea.vmem %s3021_s30, 32 }
  0x36   : > { %p2747_p6 = scmp.ne.s32.totalorder %s3021_s30, %s2746_s28  ;;  %p2754_p3 = scmp.lt.s32.totalorder %s3021_s30, %s3021_s30 }
  0x37   : > { %p2755_p5 = scmp.lt.s32.totalorder %s2753_s16, %s2746_s28 }
  0x38   : > { %p2749_p8 = pnand %p2747_p6, %p3033_p13 }
  0x39   : > { %p2756_p7 = por %p2755_p5, %p2754_p3 }
  0x3a   : > { %p2750_p0 = pneg %p2749_p8 }
  0x3c   : > { %p2757_p10 = pnand %p2756_p7, %p2750_p0 }
  0x3e   : > { %2760 = shalt.err (!%p2757_p10)
}
  0x3f   : > { %2549 = dma.hbm_to_vmem [thread:$0]  (!%p3017_p11), %s3428_s2, 16, %s3021_s30, [#allocation7]  }
  0x40   : > { %s2761_s7 = scalar_lea.hbm %s3429_s3, 9216 }
  0x41   : > { %p2762_p9 = scmp.ne.s32.totalorder %s3429_s3, %s2761_s7  ;;  %p2768_p1 = scmp.lt.u32.totalorder %s2761_s7, %s3429_s3 }
  0x43   : > { %p2764_p12 = pnand %p2762_p9, %p3033_p13 }
  0x45   : > { %p2765_p2 = pneg %p2764_p12 }
  0x47   : > { %p2770_p4 = pnand %p2768_p1, %p2765_p2 }
  0x49   : > { %2773 = shalt.err (!%p2770_p4)
}
  0x4a   : > { %s2774_s30 = scalar_lea.vmem %s3023_s8, 9216  ;;  %p2782_p3 = scmp.lt.s32.totalorder %s3023_s8, %s3023_s8 }
  0x4b   : > { %p2775_p6 = scmp.ne.s32.totalorder %s3023_s8, %s2774_s30  ;;  %p2783_p5 = scmp.lt.s32.totalorder %s2774_s30, %s2774_s30 }
  0x4d   : > { %p2777_p8 = pnand %p2775_p6, %p3033_p13  ;;  %p2784_p7 = por %p2783_p5, %p2782_p3 }
  0x4f   : > { %p2778_p0 = pneg %p2777_p8 }
  0x51   : > { %p2785_p10 = pnand %p2784_p7, %p2778_p0 }
  0x53   : > { %2788 = shalt.err (!%p2785_p10)
}
  0x54   : > { %s2930_s13 = smov 64   ;;  %s2931_s14 = smov 4  }
  0x55   : > { %2552 = dma.hbm_to_vmem [thread:$0]  (!%p3017_p11), %s3429_s3, 9216, %s3023_s8, [#allocation10], %s2930_s13, %s2930_s13, %s2931_s14  }
  0x56   : > { %s3100_s16 = sadd.s32 1, %s2925_s21   ;;  %s34_s23 = sadd.s32 1, %s2921_s20 }
  0x57   : > { %s31_s17 = ssub.s32 %s2925_s21, %s3100_s16  ;;  %p41_p9 = scmp.ne.s32.totalorder %s2921_s20, %s2917_s19 }
  0x58   : > { %p32_p13 = scmp.eq.s32.totalorder %s31_s17, 0  ;;  %p42_p12 = scmp.eq.s32.totalorder %s2925_s21, 0 }
  0x59   : > { %p2567_p2 = scmp.lt.s32.totalorder %s2925_s21, 2  ;;  %p3440_p4 = scmp.eq.s32.totalorder %s2989_s22, 1 }
  0x5a   : > { %s3110_s27 = scalar_select %p32_p13, %s2921_s20, %s34_s23  }
  0x5b   : > { %p43_p1 = por %p42_p12, %p41_p9  ;;  %p3114_p6 = por %p3440_p4, %p41_p9 }
  0x5c   : > { %s221_s29 = sand.u32 1, %s2921_s20   ;;  %s2197_s7 = sshll.u32 %s2925_s21, 9 }
  0x5d   : > { %s2034_s8 = sshll.u32 %s221_s29, 5  ;;  %s3123_s11 = scalar_lea.hbm %s3426_s0, %s2197_s7 }
  0x5e   : > { %s225_s12 = scalar_lea.vmem [#allocation3], %s2034_s8  ;;  %p3125_p11 = pnand %p2567_p2, %p43_p1 }
  0x5f   : > { %s232_s30 = sshll.u32 %s225_s12, 4  ;;  %s3131_s28 = scalar_lea.sflag [#allocation4], %s221_s29  ;;  %s3129_s30 = int_to_ptr.vmem [resolvable:$true] %s232_s30 }
  0x60   : > { %s2789_s17 = scalar_lea.hbm %s3123_s11, 512  ;;  %p2791_p0 = pneg %p3125_p11 }
  0x61   : > { %p2790_p8 = scmp.ne.s32.totalorder %s3123_s11, %s2789_s17  ;;  %s2794_s8 = scalar_lea.hbm %s3426_s0, 1024 }
  0x62   : > { %p2795_p7 = scmp.lt.u32.totalorder %s3123_s11, %s3426_s0  ;;  %p2796_p10 = scmp.lt.u32.totalorder %s2794_s8, %s2789_s17 }
  0x63   : > { %p2792_p3 = pnand %p2791_p0, %p2790_p8  ;;  %p2798_p9 = scmp.lt.u32.totalorder %s2789_s17, %s3123_s11 }
  0x64   : > { %p2797_p13 = por %p2796_p10, %p2795_p7 }
  0x65   : > { %p2793_p5 = pneg %p2792_p3 }
  0x66   : > { %p2799_p12 = por %p2798_p9, %p2797_p13 }
  0x68   : > { %p2800_p2 = pnand %p2799_p12, %p2793_p5 }
  0x6a   : > { %2803 = shalt.err (!%p2800_p2)
}
  0x6b   : > { %s2804_s29 = scalar_lea.vmem %s3129_s30, 512  ;;  %s2932_s12 = smov [#allocation3]  }
  0x6c   : > { %p2805_p1 = scmp.ne.s32.totalorder %s3129_s30, %s2804_s29  ;;  %s2809_s23 = sshll.u32 %s2932_s12, 4  ;;  %s2810_s23 = int_to_ptr.vmem [resolvable:$false] %s2809_s23 }
  0x6d   : > { %s2811_s7 = scalar_lea.vmem %s2810_s23, 1024  ;;  %p2812_p3 = scmp.lt.s32.totalorder %s3129_s30, %s2810_s23 }
  0x6e   : > { %p2807_p4 = pnand %p2805_p1, %p2791_p0  ;;  %p2813_p7 = scmp.lt.s32.totalorder %s2811_s7, %s2804_s29 }
  0x70   : > { %p2808_p8 = pneg %p2807_p4  ;;  %p2814_p10 = por %p2813_p7, %p2812_p3 }
  0x72   : > { %p2815_p13 = pnand %p2814_p10, %p2808_p8 }
  0x74   : > { %2818 = shalt.err (!%p2815_p13)
}
  0x75   : > { %2556 = dma.hbm_to_vmem [thread:$0]  (!%p3125_p11), %s3123_s11, 512, %s3129_s30, %s3131_s28, %s2930_s13, %s2930_s13, %s2931_s14  }
  0x76   : > { %p3443_p0 = scmp.ne.s32.totalorder %s3437_s26, 0 }
  0x77   : > { %s3165_s17 = sand.u32 (!%p3443_p0), 1, %s2917_s19   ;;  %p3444_p5 = scmp.ne.s32.totalorder (!%p3443_p0), %s3435_s24, 0 }
  0x78   : > { %244 = sbr.rel (%p3443_p0) target bundleno = 520 (0x208), region = 36  ;;  %s2038_s8 = sshll.u32 (!%p3443_p0), %s3165_s17, 5 }
  0x79   : > { %s247_s9 = scalar_lea.sflag (!%p3443_p0), [#allocation4], %s3165_s17  ;;  %s3171_s15 = scalar_lea.vmem (!%p3443_p0), [#allocation3], %s2038_s8 }
  0x7f   : > { %2892 = dma.done.wait (%p3444_p5), %s247_s9, 512  }
  0x80   : > { %2894 = vsyncadd (%p3444_p5), %s247_s9, 4294966784  ;;  %p3445_p11 = scmp.eq.s32.totalorder %s2989_s22, 0 }
  0x82   : > { %2896 = dma.done.wait (%p3445_p11), [#allocation7], 32   ;;  %p3446_p9 = pmov %p3445_p11 }
  0x84   : > { %2898 = vsyncadd (%p3446_p9), [#allocation7], 4294967264  ;;  %p3447_p12 = pmov %p3446_p9 }
  0x85   : > { %p3448_p2 = pmov %p3446_p9 }
  0x86   : > { %2900 = dma.done.wait (%p3447_p12), [#allocation10], 9216  }
  0x87   : > { %2902 = vsyncadd (%p3448_p2), [#allocation10], 4294958080  ;;  %v2933_v0 = vmov 0   ;;  %v2612_v1 = vld [vmem:[#allocation9 + $0x100] sm:$0xff]   ;;  %v2615_v4 = vld [vmem:[#allocation9 + $0x108] sm:$0xff]   ;;  %vm442_vm1 = vcmask 1040384  }
  0x88   : > { %365 = vst [vmem:[#allocation2] sm:$0xff] %v2933_v0  ;;  %366 = vst [vmem:[#allocation2 + $0x8] sm:$0xf] %v2933_v0  ;;  %v2613_v2 = vld [vmem:[#allocation9 + $0x140] sm:$0xff]   ;;  %2257 = vmatprep.subr.bf16.mxu0 %v2612_v1  ;;  %v2616_v5 = vld [vmem:[#allocation9 + $0x148] sm:$0xff]   ;;  %vm477_vm2 = vcmask 1043456  }
  0x89   : > { %369 = vst [vmem:[#allocation2 + $0x74] sm:$0xf] %v2933_v0  ;;  %v2614_v3 = vld [vmem:[#allocation9 + $0xc0] sm:$0xff]   ;;  %2413 = vmatprep.subr.bf16.mxu1 %v2613_v2  ;;  %v2617_v6 = vld [vmem:[#allocation9 + $0xc8] sm:$0xff]   ;;  %v2618_v7 = vld [vmem:[#allocation9 + $0x110] sm:$0xff]   ;;  %s3336_s24 = scalar_lea.vmem [#allocation11], %s2038_s8 }
  0x8a   : > { %2258 = vmatpush3.bf16.msra.mxu0 %v2614_v3  ;;  %2414 = vmatpush3.bf16.msra.mxu1 %v2613_v2  ;;  %v2619_v8 = vld [vmem:[#allocation9 + $0x150] sm:$0xff]   ;;  %v2621_v10 = vld [vmem:[#allocation9 + $0x118] sm:$0xff]   ;;  %v2624_v13 = vld [vmem:[#allocation9 + $0x120] sm:$0xff]   ;;  %vm443_vm0 = vsmask.f32 256  ;;  %s1881_s26 = sshll.u32 %s3336_s24, 4  ;;  %s3345_s26 = int_to_ptr.vmem [resolvable:$true] %s1881_s26 }
  0x8b   : > { %2259 = vmatprep.subr.bf16.mxu0 %v2615_v4  ;;  %2415 = vmatprep.subr.bf16.mxu1 %v2616_v5  ;;  %v2620_v9 = vld [vmem:[#allocation9 + $0xd0] sm:$0xff]   ;;  %v2622_v11 = vld [vmem:[#allocation9 + $0x158] sm:$0xff]   ;;  %v2625_v14 = vld [vmem:[#allocation9 + $0x160] sm:$0xff]   ;;  %vm478_vm3 = vsmask.f32 3328  ;;  %s2214_s13 = sshll.u32 %s2989_s22, 9 }
  0x8c   : > { %v2623_v12 = vld [vmem:[#allocation9 + $0xd8] sm:$0xff]   ;;  %v2626_v15 = vld [vmem:[#allocation9 + $0xe0] sm:$0xff]   ;;  %v2627_v16 = vld [vmem:[#allocation9 + $0x128] sm:$0xff]   ;;  %s3350_s30 = scalar_lea.hbm %s3430_s4, %s2214_s13  ;;  %s1863_s28 = scalar_lea.sflag [#allocation5], %s3165_s17 }
  0x8d   : > { %v2628_v17 = vld [vmem:[#allocation9 + $0x168] sm:$0xff]   ;;  %v2630_v19 = vld [vmem:[#allocation9 + $0x130] sm:$0xff]   ;;  %v2633_v22 = vld [vmem:[#allocation9 + $0x138] sm:$0xff]   ;;  %s2819_s10 = scalar_lea.vmem %s3345_s26, 512  ;;  %s2934_s29 = smov [#allocation11]  }
  0x8e   : > { %2260 = vmatpush3.bf16.msra.mxu0 %v2617_v6  ;;  %2416 = vmatpush3.bf16.msra.mxu1 %v2616_v5  ;;  %v2629_v18 = vld [vmem:[#allocation9 + $0xe8] sm:$0xff]   ;;  %v2631_v20 = vld [vmem:[#allocation9 + $0x170] sm:$0xff]   ;;  %v2216_v23 = vld [vmem:[%s3171_s15] sm:$0xff]   ;;  %p2820_p1 = scmp.ne.s32.totalorder %s3345_s26, %s2819_s10  ;;  %s2823_s12 = sshll.u32 %s2934_s29, 4  ;;  %s2824_s12 = int_to_ptr.vmem [resolvable:$false] %s2823_s12 }
  0x8f   : > { %2261 = vmatprep.subr.bf16.mxu0 %v2618_v7  ;;  %2417 = vmatprep.subr.bf16.mxu1 %v2619_v8  ;;  %v2632_v21 = vld [vmem:[#allocation9 + $0xf0] sm:$0xff]   ;;  %v3189_v24 = vld [vmem:[#allocation6] ss:$0 sm:$0xff]  ;;  %v2217_v26 = vunpack.c.l.bf16 %v2216_v23  ;;  %v2218_v27 = vunpack.c.h.bf16 %v2216_v23  ;;  %v3191_v29 = vld [vmem:[#allocation8] ss:$0 sm:$0xff]  ;;  %s2825_s23 = scalar_lea.vmem %s2824_s12, 1024  ;;  %p2826_p3 = scmp.lt.s32.totalorder %s3345_s26, %s2824_s12 }
  0x90   : > { %v2634_v25 = vld [vmem:[#allocation9 + $0x178] sm:$0xff]   ;;  %v2251_v32 = vld [vmem:[%s3171_s15 + $0x8] sm:$0xff]   ;;  %vm3207_vm4 = vmand %vm442_vm1, %vm443_vm0  ;;  %p2821_p4 = pnand %p2820_p1, %p3114_p6  ;;  %p2827_p7 = scmp.lt.s32.totalorder %s2825_s23, %s2819_s10 }
  0x91   : > { %v2635_v28 = vld [vmem:[#allocation9 + $0xf8] sm:$0xff]   ;;  %v318_v30 = vmul.f32 %v2217_v26, %v3189_v24  ;;  %v319_v31 = vmul.f32 %v2218_v27, %v3189_v24  ;;  %v2637_v33 = vld [vmem:[#allocation9 + $0x40] sm:$0xff]   ;;  %v2221_v34 = vunpack.c.l.bf16 %v2251_v32  ;;  %v2222_v35 = vunpack.c.h.bf16 %v2251_v32  ;;  %vm3213_vm5 = vmand %vm477_vm2, %vm478_vm3 }
  0x92   : > { %2262 = vmatpush3.bf16.msra.mxu0 %v2620_v9  ;;  %2418 = vmatpush3.bf16.msra.mxu1 %v2619_v8  ;;  %v3198_v38 = vld [vmem:[#allocation9 + $0x80] sm:$0xff]   ;;  %v2654_v59 = vld [vmem:[#allocation9 + $0xa8] sm:$0xff]   ;;  %p2822_p8 = pneg %p2821_p4  ;;  %p2828_p10 = por %p2827_p7, %p2826_p3 }
  0x93   : > { %2263 = vmatprep.subr.bf16.mxu0 %v2621_v10  ;;  %2419 = vmatprep.subr.bf16.mxu1 %v2622_v11  ;;  %v333_v36 = vadd.f32 %v3191_v29, %v318_v30  ;;  %v334_v37 = vadd.f32 %v3191_v29, %v319_v31  ;;  %v320_v39 = vmul.f32 %v2221_v34, %v3189_v24  ;;  %v2640_v23 = vld [vmem:[#allocation9] sm:$0xff]   ;;  %v2641_v30 = vld [vmem:[#allocation9 + $0x48] sm:$0xff]  }
  0x94   : > { %v321_v40 = vmul.f32 %v2222_v35, %v3189_v24  ;;  %p2829_p13 = pnand %p2828_p10, %p2822_p8 }
  0x95   : > { %v341_v41 = vmax.f32 %v333_v36, 0.0  ;;  %v342_v42 = vmax.f32 %v334_v37, 0.0  ;;  %v335_v43 = vadd.f32 %v3191_v29, %v320_v39 }
  0x96   : > { %2264 = vmatpush3.bf16.msra.mxu0 %v2623_v12  ;;  %2420 = vmatpush3.bf16.msra.mxu1 %v2622_v11  ;;  %v336_v44 = vadd.f32 %v3191_v29, %v321_v40 }
  0x97   : > { %2265 = vmatprep.subr.bf16.mxu0 %v2624_v13  ;;  %2421 = vmatprep.subr.bf16.mxu1 %v2625_v14  ;;  %v2198_v45 = vpack.c.bf16 %v341_v41, %v341_v41  ;;  %v2199_v46 = vpack.c.bf16 %v342_v42, %v342_v42  ;;  %v343_v47 = vmax.f32 %v335_v43, 0.0  ;;  %v349_v53 = vpack.c.bf16 %v342_v42, %v341_v41 }
  0x98   : > { %v344_v48 = vmax.f32 %v336_v44, 0.0  ;;  %v2253_v44 = vld [vmem:[%s3171_s15 + $0x18] sm:$0xff]  }
  0x99   : > { %v379_v49 = vshrl.u32 %v2198_v45, 16  ;;  %v382_v50 = vshll.u32 %v2198_v45, 16  ;;  %v386_v51 = vshrl.u32 %v2199_v46, 16  ;;  %v389_v52 = vshll.u32 %v2199_v46, 16  ;;  %v2643_v45 = vld [vmem:[#allocation9 + $0x8] sm:$0xff]  }
  0x9a   : > { %2266 = vmatpush3.bf16.msra.mxu0 %v2626_v15  ;;  %2422 = vmatpush3.bf16.msra.mxu1 %v2625_v14  ;;  %v2200_v54 = vpack.c.bf16 %v343_v47, %v343_v47  ;;  %v2201_v55 = vpack.c.bf16 %v344_v48, %v344_v48  ;;  %v350_v56 = vpack.c.bf16 %v344_v48, %v343_v47  ;;  %v2229_v47 = vunpack.c.l.bf16 %v2253_v44 }
  0x9b   : > { %2267 = vmatprep.subr.bf16.mxu0 %v2627_v16  ;;  %2423 = vmatprep.subr.bf16.mxu1 %v2628_v17  ;;  %v381_v57 = vrot.slane %v379_v49, 7  ;;  %v388_v58 = vrot.slane %v386_v51, 7  ;;  %v453_v60 = vrot.slane %v382_v50, 1  ;;  %v455_v61 = vrot.slane %v389_v52, 1  ;;  %v2252_v16 = vld [vmem:[%s3171_s15 + $0x10] sm:$0xff]  }
  0x9c   : > { %v393_v63 = vshrl.u32 %v2200_v54, 16  ;;  %v396_v1 = vshll.u32 %v2200_v54, 16  ;;  %v400_v2 = vshrl.u32 %v2201_v55, 16  ;;  %v403_v3 = vshll.u32 %v2201_v55, 16 }
  0x9d   : > { %v384_v4 = vor.u32 %v382_v50, %v381_v57  ;;  %v391_v5 = vor.u32 %v389_v52, %v388_v58  ;;  %v454_v6 = vor.u32 %v453_v60, %v379_v49  ;;  %v456_v7 = vor.u32 %v455_v61, %v386_v51  ;;  %v2644_v49 = vld [vmem:[#allocation9 + $0x50] sm:$0xff]   ;;  %v2647_v57 = vld [vmem:[#allocation9 + $0x58] sm:$0xff]  }
  0x9e   : > { %2268 = vmatpush3.bf16.msra.mxu0 %v2629_v18  ;;  %2424 = vmatpush3.bf16.msra.mxu1 %v2628_v17  ;;  %v457_v8 = vrot.slane %v396_v1, 1  ;;  %v459_v9 = vrot.slane %v403_v3, 1  ;;  %v395_v10 = vrot.slane %v393_v63, 7  ;;  %v402_v11 = vrot.slane %v400_v2, 7 }
  0x9f   : > { %2269 = vmatprep.subr.bf16.mxu0 %v2630_v19  ;;  %2425 = vmatprep.subr.bf16.mxu1 %v2631_v20  ;;  %v3219_v12 = vsel %vm3207_vm4, 0, %v384_v4  ;;  %v446_v13 = vsel %vm3207_vm4, 0, %v391_v5  ;;  %v480_v14 = vsel %vm3213_vm5, %v454_v6, 0  ;;  %v481_v15 = vsel %vm3213_vm5, %v456_v7, 0 }
  0xa0   : > { %v3229_v17 = vcombine.low %v3219_v12, %v349_v53  ;;  %v3232_v18 = vsel %vm477_vm2, %v446_v13, %v349_v53  ;;  %v2055_v19 = vcombine.low %v480_v14, %v480_v14  ;;  %v405_v26 = vor.u32 %v403_v3, %v402_v11  ;;  %v2650_v13 = vld [vmem:[#allocation9 + $0x60] sm:$0xff]  }
  0xa1   : > { %v2697_v27 = vcombine.low %v3219_v12, %v3232_v18  ;;  %v2225_v31 = vunpack.c.l.bf16 %v2252_v16  ;;  %v2226_v32 = vunpack.c.h.bf16 %v2252_v16  ;;  %v2230_v48 = vunpack.c.h.bf16 %v2253_v44  ;;  %v2648_v44 = vld [vmem:[#allocation9 + $0x98] sm:$0xff]  }
  0xa2   : > { %2270 = vmatpush3.bf16.msra.mxu0 %v2632_v21  ;;  %2426 = vmatpush3.bf16.msra.mxu1 %v2631_v20  ;;  %v2058_v20 = vcombine.low %v481_v15, %v481_v15  ;;  %v458_v21 = vor.u32 %v457_v8, %v393_v63  ;;  %554 = vst [vmem:[#allocation2 + $0x14] sm:$0xf] %v2055_v19  ;;  %v448_v36 = vsel %vm3207_vm4, 0, %v405_v26  ;;  %v2642_v63 = vld [vmem:[#allocation9 + $0x88] sm:$0xff]  }
  0xa3   : > { %2271 = vmatprep.subr.bf16.mxu0 %v2633_v22  ;;  %2427 = vmatprep.subr.bf16.mxu1 %v2634_v25  ;;  %v460_v22 = vor.u32 %v459_v9, %v400_v2  ;;  %v3252_v41 = vsel %vm477_vm2, %v448_v36, %v350_v56  ;;  %v322_v42 = vmul.f32 %v2225_v31, %v3189_v24  ;;  %v2649_v2 = vld [vmem:[#allocation9 + $0x18] sm:$0xff]  }
  0xa4   : > { %556 = vst [vmem:[#allocation2 + $0x20] sm:$0xf] %v2058_v20  ;;  %v323_v43 = vmul.f32 %v2226_v32, %v3189_v24  ;;  %v324_v52 = vmul.f32 %v2229_v47, %v3189_v24  ;;  %v325_v53 = vmul.f32 %v2230_v48, %v3189_v24  ;;  %v2653_v32 = vld [vmem:[#allocation9 + $0x68] sm:$0xff]  }
  0xa5   : > { %v483_v34 = vsel %vm3213_vm5, %v460_v22, 0  ;;  %v337_v50 = vadd.f32 %v3191_v29, %v322_v42 }
  0xa6   : > { %2272 = vmatpush3.bf16.msra.mxu0 %v2635_v28  ;;  %2428 = vmatpush3.bf16.msra.mxu1 %v2634_v25  ;;  %v398_v25 = vor.u32 %v396_v1, %v395_v10  ;;  %v2075_v28 = vcombine.high %v3229_v17, %v3232_v18  ;;  %v2063_v39 = vcombine.low %v483_v34, %v483_v34  ;;  %v2645_v10 = vld [vmem:[#allocation9 + $0x90] sm:$0xff]  }
  0xa7   : > { %2309 = vmatprep.subr.bf16.mxu0 %v2637_v33  ;;  %2437 = vmatprep.subr.bf16.mxu1 %v3198_v38  ;;  %v482_v33 = vsel %vm3213_vm5, %v458_v21, 0  ;;  %v338_v51 = vadd.f32 %v3191_v29, %v323_v43  ;;  %v345_v58 = vmax.f32 %v337_v50, 0.0  ;;  %v339_v61 = vadd.f32 %v3191_v29, %v324_v52 }
  0xa8   : > { %v3244_v35 = vsel %vm3207_vm4, 0, %v398_v25  ;;  %938 = vmatprep.mubr.bf16.mxu0 %v2075_v28  ;;  %v2060_v37 = vcombine.low %v482_v33, %v482_v33  ;;  %560 = vst [vmem:[#allocation2 + $0x38] sm:$0xf] %v2063_v39  ;;  %v340_v1 = vadd.f32 %v3191_v29, %v325_v53  ;;  %v2652_v28 = vld [vmem:[#allocation9 + $0x20] sm:$0xff]  }
  0xa9   : > { %v3249_v40 = vcombine.low %v3244_v35, %v350_v56  ;;  %939 = vmatmul.mubr.bf16.vlgmr.msra.gmra.mrb[0].mxu0 %v2697_v27  ;;  %v2698_v55 = vcombine.low %v3244_v35, %v3252_v41  ;;  %v2646_v56 = vld [vmem:[#allocation9 + $0x10] sm:$0xff]   ;;  %v346_v60 = vmax.f32 %v338_v51, 0.0  ;;  %v2202_v3 = vpack.c.bf16 %v345_v58, %v345_v58 }
  0xaa   : > { %558 = vst [vmem:[#allocation2 + $0x2c] sm:$0xf] %v2060_v37  ;;  %2310 = vmatpush3.bf16.msra.mxu0 %v2640_v23  ;;  %v347_v24 = vmax.f32 %v339_v61, 0.0  ;;  %v348_v14 = vmax.f32 %v340_v1, 0.0  ;;  %v2651_v1 = vld [vmem:[#allocation9 + $0xa0] sm:$0xff]  }
  0xab   : > { %v2078_v46 = vcombine.high %v3249_v40, %v3252_v41  ;;  %2311 = vmatprep.subr.bf16.mxu0 %v2641_v30  ;;  %v2636_v54 = vld [vmem:[#allocation2 + $0x14] ss:$12 sps:$4 sm:$0xff]   ;;  %v2203_v4 = vpack.c.bf16 %v346_v60, %v346_v60  ;;  %v407_v6 = vshrl.u32 %v2202_v3, 16  ;;  %v410_v7 = vshll.u32 %v2202_v3, 16 }
  0xac   : > { %2429 = vmatprep.mubr.bf16.mxu1 %v2636_v54  ;;  %v351_v11 = vpack.c.bf16 %v346_v60, %v345_v58  ;;  %v2204_v15 = vpack.c.bf16 %v347_v24, %v347_v24  ;;  %v352_v21 = vpack.c.bf16 %v348_v14, %v347_v24  ;;  %v2205_v22 = vpack.c.bf16 %v348_v14, %v348_v14  ;;  %v2657_v60 = vld [vmem:[#allocation9 + $0x70] sm:$0xff]  }
  0xad   : > { %946 = vmatprep.mubr.bf16.mxu0 %v2078_v46  ;;  %v414_v8 = vshrl.u32 %v2203_v4, 16  ;;  %v417_v9 = vshll.u32 %v2203_v4, 16  ;;  %v409_v29 = vrot.slane %v407_v6, 7  ;;  %v461_v19 = vrot.slane %v410_v7, 1  ;;  %v2658_v14 = vld [vmem:[#allocation9 + $0xb0] sm:$0xff]  }
  0xae   : > { %2312 = vmatpush3.bf16.msra.mxu0 %v2643_v45  ;;  %v421_v23 = vshrl.u32 %v2204_v15, 16  ;;  %v424_v25 = vshll.u32 %v2204_v15, 16  ;;  %v428_v34 = vshrl.u32 %v2205_v22, 16  ;;  %v2664_v15 = vld [vmem:[#allocation2 + $0x8] ss:$12 sps:$4 sm:$0xff]  }
  0xaf   : > { %2313 = vmatprep.subr.bf16.mxu0 %v2644_v49  ;;  %v416_v16 = vrot.slane %v414_v8, 7  ;;  %v463_v20 = vrot.slane %v417_v9, 1  ;;  %v412_v26 = vor.u32 %v410_v7, %v409_v29  ;;  %v462_v30 = vor.u32 %v461_v19, %v407_v6  ;;  %v2660_v7 = vld [vmem:[#allocation9 + $0x30] sm:$0xff]  }
  0xb0   : > { %v423_v33 = vrot.slane %v421_v23, 7  ;;  %v465_v36 = vrot.slane %v424_v25, 1  ;;  %v430_v48 = vrot.slane %v428_v34, 7  ;;  %v2701_v19 = vcombine.low %v2933_v0, %v3219_v12 }
  0xb1   : > { %v2639_v5 = vld [vmem:[#allocation2 + $0x2c] ss:$12 sps:$4 sm:$0xff]   ;;  %947 = vmatmul.mubr.bf16.gmra.mrb[4].mxu0 %v2698_v55  ;;  %v419_v27 = vor.u32 %v417_v9, %v416_v16  ;;  %v464_v31 = vor.u32 %v463_v20, %v414_v8  ;;  %v3270_v37 = vsel %vm3207_vm4, 0, %v412_v26  ;;  %v484_v42 = vsel %vm3213_vm5, %v462_v30, 0  ;;  %v2655_v55 = vld [vmem:[#allocation9 + $0x28] sm:$0xff]  }
  0xb2   : > { %2314 = vmatpush3.bf16.msra.mxu0 %v2646_v56  ;;  %2430 = vmatmul.mubr.bf16.vlgmr.msra.gmra.mrb[0].mxu1 %v2639_v5  ;;  %v3279_v45 = vcombine.low %v3270_v37, %v351_v11  ;;  %v426_v47 = vor.u32 %v424_v25, %v423_v33  ;;  %v2065_v49 = vcombine.low %v484_v42, %v484_v42  ;;  %v2661_v8 = vld [vmem:[#allocation9 + $0x78] sm:$0xff]   ;;  %v2670_v25 = vld [vmem:[#allocation9 + $0x208] sm:$0xff]  }
  0xb3   : > { %2315 = vmatprep.subr.bf16.mxu0 %v2647_v57  ;;  %2438 = vmatpush3.bf16.msra.mxu1 %v3198_v38  ;;  %v431_v38 = vshll.u32 %v2205_v22, 16  ;;  %v450_v39 = vsel %vm3207_vm4, 0, %v419_v27  ;;  %v485_v43 = vsel %vm3213_vm5, %v464_v31, 0  ;;  %v466_v51 = vor.u32 %v465_v36, %v421_v23  ;;  %v2662_v16 = vld [vmem:[#allocation9 + $0xb8] sm:$0xff]   ;;  %v2666_v22 = vld [vmem:[#allocation9 + $0x200] sm:$0xff]   ;;  %v2671_v26 = vld [vmem:[#allocation9 + $0x188] sm:$0xff]  }
  0xb4   : > { %2439 = vmatprep.subr.bf16.mxu1 %v2642_v63  ;;  %v3282_v46 = vsel %vm477_vm2, %v450_v39, %v351_v11  ;;  %v2068_v50 = vcombine.low %v485_v43, %v485_v43  ;;  %v3290_v57 = vsel %vm3207_vm4, 0, %v426_v47  ;;  %562 = vst [vmem:[#allocation2 + $0x44] sm:$0xf] %v2065_v49  ;;  %v2111_v11 = vcombine.high %v2933_v0, %v3229_v17  ;;  %v2668_v17 = vld [vmem:[#allocation9 + $0x180] sm:$0xff]   ;;  %v2672_v0 = vld [vmem:[#allocation9 + $0x1d0] sm:$0xff]   ;;  %v2675_v30 = vld [vmem:[#allocation9 + $0x1d8] sm:$0xff]  }
  0xb5   : > { %v467_v52 = vrot.slane %v431_v38, 1  ;;  %v2081_v53 = vcombine.high %v3279_v45, %v3282_v46  ;;  %v2699_v54 = vcombine.low %v3270_v37, %v3282_v46  ;;  %v433_v56 = vor.u32 %v431_v38, %v430_v48  ;;  %v2667_v23 = vld [vmem:[#allocation2 + $0x20] ss:$12 sps:$4 sm:$0xff]   ;;  %v2681_v42 = vld [vmem:[#allocation9 + $0x1e8] sm:$0xff]   ;;  %v2689_v48 = vld [vmem:[#allocation9 + $0x1f8] sm:$0xff]  }
  0xb6   : > { %2316 = vmatpush3.bf16.msra.mxu0 %v2649_v2  ;;  %v3293_v58 = vcombine.low %v3290_v57, %v352_v21  ;;  %564 = vst [vmem:[#allocation2 + $0x50] sm:$0xf] %v2068_v50  ;;  %v3314_v20 = vcombine.high %v3232_v18, %v3249_v40  ;;  %v2702_v40 = vcombine.low %v3232_v18, %v3244_v35  ;;  %v2674_v27 = vld [vmem:[#allocation9 + $0x190] sm:$0xff]   ;;  %v2678_v18 = vld [vmem:[#allocation9 + $0x1e0] sm:$0xff]   ;;  %v2676_v35 = vld [vmem:[#allocation9 + $0x218] sm:$0xff]  }
  0xb7   : > { %2317 = vmatprep.subr.bf16.mxu0 %v2650_v13  ;;  %2440 = vmatpush3.bf16.msra.mxu1 %v2642_v63  ;;  %v468_v61 = vor.u32 %v467_v52, %v428_v34  ;;  %v486_v63 = vsel %vm3213_vm5, %v466_v51, 0  ;;  %v452_v2 = vsel %vm3207_vm4, 0, %v433_v56  ;;  %v2665_v13 = vld [vmem:[#allocation9 + $0x1c0] sm:$0xff]   ;;  %v2673_v31 = vld [vmem:[#allocation9 + $0x210] sm:$0xff]   ;;  %v2703_v38 = vcombine.low %v3252_v41, %v3270_v37  ;;  %v2691_v50 = vld [vmem:[#allocation9 + $0x1b8] sm:$0xff]  }
  0xb8   : > { %2441 = vmatprep.subr.bf16.mxu1 %v2645_v10  ;;  %954 = vmatprep.mubr.bf16.mxu0 %v2081_v53  ;;  %v2070_v3 = vcombine.low %v486_v63, %v486_v63  ;;  %v3300_v4 = vsel %vm477_vm2, %v452_v2, %v352_v21  ;;  %v2669_v21 = vld [vmem:[#allocation9 + $0x1c8] sm:$0xff]   ;;  %v2692_v34 = vld [vmem:[#allocation2 + $0x20] ss:$12 sps:$4 sm:$0xff]   ;;  %v2120_v39 = vcombine.high %v3282_v46, %v3293_v58  ;;  %v2690_v51 = vld [vmem:[#allocation9 + $0x238] sm:$0xff]  }
  0xb9   : > { %955 = vmatmul.mubr.bf16.gmra.mrb[8].mxu0 %v2699_v54  ;;  %v487_v24 = vsel %vm3213_vm5, %v468_v61, 0  ;;  %v2084_v5 = vcombine.high %v3293_v58, %v3300_v4  ;;  %v2700_v9 = vcombine.low %v3290_v57, %v3300_v4  ;;  %v2680_v36 = vld [vmem:[#allocation9 + $0x1a0] sm:$0xff]   ;;  %v2704_v37 = vcombine.low %v3282_v46, %v3290_v57  ;;  %v2688_v47 = vld [vmem:[#allocation9 + $0x1b0] sm:$0xff]  }
  0xba   : > { %2318 = vmatpush3.bf16.msra.mxu0 %v2652_v28  ;;  %v2073_v6 = vcombine.low %v487_v24, %v487_v24  ;;  %566 = vst [vmem:[#allocation2 + $0x5c] sm:$0xf] %v2070_v3  ;;  %v2117_v28 = vcombine.high %v3252_v41, %v3279_v45  ;;  %v2679_v43 = vld [vmem:[#allocation9 + $0x220] sm:$0xff]   ;;  %v2686_v45 = vld [vmem:[#allocation9 + $0x1f0] sm:$0xff]   ;;  %v2682_v41 = vld [vmem:[#allocation9 + $0x228] sm:$0xff]  }
  0xbb   : > { %2319 = vmatprep.subr.bf16.mxu0 %v2653_v32  ;;  %2442 = vmatpush3.bf16.msra.mxu1 %v2645_v10  ;;  %v2663_v10 = vld [vmem:[#allocation9 + $0x38] sm:$0xff]   ;;  %v2687_v49 = vld [vmem:[#allocation9 + $0x230] sm:$0xff]   ;;  %v2696_v54 = vld [vmem:[#allocation2] sm:$0xff] }
  0xbc   : > { %2443 = vmatprep.subr.bf16.mxu1 %v2648_v44  ;;  %962 = vmatprep.mubr.bf16.mxu0 %v2084_v5  ;;  %568 = vst [vmem:[#allocation2 + $0x68] sm:$0xf] %v2073_v6  ;;  %v2684_v12 = vld [vmem:[#allocation2 + $0x38] ss:$12 sps:$4 sm:$0xff]   ;;  %v2155_v56 = vcombine.low %v3300_v4, %v2696_v54 }
  0xbd   : > { %v2656_v62 = vld [vmem:[#allocation2 + $0x44] ss:$12 sps:$4 sm:$0xff]   ;;  %v2677_v32 = vld [vmem:[#allocation9 + $0x198] sm:$0xff]  }
  0xbe   : > { %2320 = vmatpush3.bf16.msra.mxu0 %v2655_v55  ;;  %2433 = vmatprep.mubr.bf16.mxu1 %v2656_v62  ;;  %v2693_v46 = vld [vmem:[#allocation2 + $0x38] ss:$12 sps:$4 sm:$0xff]   ;;  %v2156_v55 = vcombine.high %v3300_v4, %v2696_v54 }
  0xbf   : > { %2444 = vmatpush3.bf16.msra.mxu1 %v2648_v44  ;;  %2321 = vmatprep.subr.bf16.mxu0 %v2657_v60  ;;  %v2683_v44 = vld [vmem:[#allocation9 + $0x1a8] sm:$0xff]  }
  0xc0   : > { %2445 = vmatprep.subr.bf16.mxu1 %v2651_v1 }
  0xc1   : > { %963 = vmatmul.mubr.bf16.gmra.mrb[12].mxu0 %v2700_v9  ;;  %v2685_v33 = vld [vmem:[#allocation2 + $0x50] ss:$12 sps:$4 sm:$0xff]  }
  0xc2   : > { %2322 = vmatpush3.bf16.msra.mxu0 %v2660_v7  ;;  %1276 = vmatprep.mubr.bf16.mxu0 %v2111_v11  ;;  %v2694_v52 = vld [vmem:[#allocation2 + $0x50] ss:$12 sps:$4 sm:$0xff]  }
  0xc3   : > { %2446 = vmatpush3.bf16.msra.mxu1 %v2651_v1  ;;  %2323 = vmatprep.subr.bf16.mxu0 %v2661_v8  ;;  %v2659_v29 = vld [vmem:[#allocation2 + $0x5c] ss:$12 sps:$4 sm:$0xff]  }
  0xc4   : > { %2447 = vmatprep.subr.bf16.mxu1 %v2654_v59  ;;  %2434 = vmatmul.mubr.bf16.gmra.mrb[4].mxu1 %v2659_v29  ;;  %v2695_v53 = vld [vmem:[#allocation2 + $0x68] ss:$12 sps:$4 sm:$0xff]  }
  0xc5   : > { %2453 = vmatprep.mubr.bf16.mxu1 %v2664_v15 }
  0xc6   : > { %2324 = vmatpush3.bf16.msra.mxu0 %v2663_v10 }
  0xc7   : > { %2448 = vmatpush3.bf16.msra.mxu1 %v2654_v59  ;;  %2361 = vmatprep.subr.bf16.mxu0 %v2665_v13 }
  0xc8   : > { %2449 = vmatprep.subr.bf16.mxu1 %v2658_v14 }
  0xc9   : > { %1277 = vmatmul.mubr.bf16.vlgmr.msra.gmra.mrb[16].mxu0 %v2701_v19 }
  0xca   : > { %2362 = vmatpush3.bf16.msra.mxu0 %v2668_v17  ;;  %1284 = vmatprep.mubr.bf16.mxu0 %v3314_v20 }
  0xcb   : > { %2450 = vmatpush3.bf16.msra.mxu1 %v2658_v14  ;;  %2363 = vmatprep.subr.bf16.mxu0 %v2669_v21 }
  0xcc   : > { %2451 = vmatprep.subr.bf16.mxu1 %v2662_v16 }
  0xce   : > { %2364 = vmatpush3.bf16.msra.mxu0 %v2671_v26 }
  0xcf   : > { %2452 = vmatpush3.bf16.msra.mxu1 %v2662_v16  ;;  %2365 = vmatprep.subr.bf16.mxu0 %v2672_v0 }
  0xd0   : > { %2461 = vmatprep.subr.bf16.mxu1 %v2666_v22 }
  0xd1   : > { %1285 = vmatmul.mubr.bf16.gmra.mrb[20].mxu0 %v2702_v40 }
  0xd2   : > { %2454 = vmatmul.mubr.bf16.vlgmr.msra.gmra.mrb[0].mxu1 %v2667_v23  ;;  %2366 = vmatpush3.bf16.msra.mxu0 %v2674_v27 }
  0xd3   : > { %2462 = vmatpush3.bf16.msra.mxu1 %v2666_v22  ;;  %2457 = vmatprep.mubr.bf16.mxu1 %v2684_v12 }
  0xd4   : > { %2463 = vmatprep.subr.bf16.mxu1 %v2670_v25  ;;  %1292 = vmatprep.mubr.bf16.mxu0 %v2117_v28 }
  0xd5   : > { %2367 = vmatprep.subr.bf16.mxu0 %v2675_v30 }
  0xd6   : > { %2368 = vmatpush3.bf16.msra.mxu0 %v2677_v32 }
  0xd7   : > { %2464 = vmatpush3.bf16.msra.mxu1 %v2670_v25  ;;  %2369 = vmatprep.subr.bf16.mxu0 %v2678_v18 }
  0xd8   : > { %2465 = vmatprep.subr.bf16.mxu1 %v2673_v31 }
  0xd9   : > { %1293 = vmatmul.mubr.bf16.gmra.mrb[24].mxu0 %v2703_v38 }
  0xda   : > { %2458 = vmatmul.mubr.bf16.gmra.mrb[4].mxu1 %v2685_v33  ;;  %2370 = vmatpush3.bf16.msra.mxu0 %v2680_v36 }
  0xdb   : > { %2466 = vmatpush3.bf16.msra.mxu1 %v2673_v31  ;;  %2477 = vmatprep.mubr.bf16.mxu1 %v2692_v34 }
  0xdc   : > { %2467 = vmatprep.subr.bf16.mxu1 %v2676_v35  ;;  %1300 = vmatprep.mubr.bf16.mxu0 %v2120_v39 }
  0xdd   : > { %2371 = vmatprep.subr.bf16.mxu0 %v2681_v42 }
  0xde   : > { %2372 = vmatpush3.bf16.msra.mxu0 %v2683_v44 }
  0xdf   : > { %2468 = vmatpush3.bf16.msra.mxu1 %v2676_v35  ;;  %2373 = vmatprep.subr.bf16.mxu0 %v2686_v45 }
  0xe0   : > { %2469 = vmatprep.subr.bf16.mxu1 %v2679_v43 }
  0xe1   : > { %1301 = vmatmul.mubr.bf16.gmra.mrb[28].mxu0 %v2704_v37 }
  0xe2   : > { %2374 = vmatpush3.bf16.msra.mxu0 %v2688_v47  ;;  %1680 = vmatprep.mubr.bf16.mxu0 %v3314_v20 }
  0xe3   : > { %2470 = vmatpush3.bf16.msra.mxu1 %v2679_v43  ;;  %2375 = vmatprep.subr.bf16.mxu0 %v2689_v48 }
  0xe4   : > { %2471 = vmatprep.subr.bf16.mxu1 %v2682_v41 }
  0xe6   : > { %2376 = vmatpush3.bf16.msra.mxu0 %v2691_v50 }
  0xe7   : > { %2472 = vmatpush3.bf16.msra.mxu1 %v2682_v41 }
  0xe8   : > { %2473 = vmatprep.subr.bf16.mxu1 %v2687_v49 }
  0xe9   : > { %1681 = vmatmul.mubr.bf16.vlgmr.msra.gmra.mrb[32].mxu0 %v2702_v40 }
  0xea   : > { %1688 = vmatprep.mubr.bf16.mxu0 %v2117_v28 }
  0xeb   : > { %2474 = vmatpush3.bf16.msra.mxu1 %v2687_v49 }
  0xec   : > { %2475 = vmatprep.subr.bf16.mxu1 %v2690_v51 }
  0xef   : > { %2476 = vmatpush3.bf16.msra.mxu1 %v2690_v51 }
  0xf1   : > { %1689 = vmatmul.mubr.bf16.gmra.mrb[36].mxu0 %v2703_v38 }
  0xf2   : > { %2478 = vmatmul.mubr.bf16.vlgmr.msra.gmra.mrb[0].mxu1 %v2693_v46  ;;  %1696 = vmatprep.mubr.bf16.mxu0 %v2120_v39 }
  0xf3   : > { %2481 = vmatprep.mubr.bf16.mxu1 %v2694_v52 }
  0xf9   : > { %1697 = vmatmul.mubr.bf16.gmra.mrb[40].mxu0 %v2704_v37 }
  0xfa   : > { %2482 = vmatmul.mubr.bf16.gmra.mrb[4].mxu1 %v2695_v53  ;;  %1704 = vmatprep.mubr.bf16.mxu0 %v2156_v55 }
 0x101   : > { %1705 = vmatmul.mubr.bf16.gmra.mrb[44].mxu0 %v2155_v56 }
 0x17c   : > { %v2273_v57 = vpop.f32.mrb[0].mxu0 }
 0x17d   : > { %v2274_v58 = vpop.f32.mrb[1].mxu0 }
 0x17e   : > { %v2275_v60 = vadd.f32 %v2274_v58, %v2273_v57  ;;  %v2276_v61 = vpop.f32.mrb[2].mxu0 }
 0x17f   : > { %v2277_v63 = vpop.f32.mrb[3].mxu0 }
 0x180   : > { %v2278_v1 = vadd.f32 %v2277_v63, %v2276_v61 }
 0x184   : > { %v2279_v2 = vpop.f32.mrb[4].mxu0 }
 0x185   : > { %v2280_v3 = vpop.f32.mrb[5].mxu0 }
 0x186   : > { %v2281_v24 = vadd.f32 %v2280_v3, %v2279_v2  ;;  %v2282_v5 = vpop.f32.mrb[6].mxu0 }
 0x187   : > { %v2283_v6 = vpop.f32.mrb[7].mxu0 }
 0x188   : > { %v2284_v7 = vadd.f32 %v2283_v6, %v2282_v5 }
 0x18c   : > { %v2285_v8 = vpop.f32.mrb[8].mxu0 }
 0x18d   : > { %v2286_v59 = vpop.f32.mrb[9].mxu0 }
 0x18e   : > { %v2287_v9 = vadd.f32 %v2286_v59, %v2285_v8  ;;  %v2288_v10 = vpop.f32.mrb[10].mxu0 }
 0x18f   : > { %v2289_v62 = vpop.f32.mrb[11].mxu0 }
 0x190   : > { %v2290_v11 = vadd.f32 %v2289_v62, %v2288_v10 }
 0x194   : > { %v2291_v4 = vpop.f32.mrb[12].mxu0 }
 0x195   : > { %v2292_v13 = vpop.f32.mrb[13].mxu0 }
 0x196   : > { %v2293_v14 = vadd.f32 %v2292_v13, %v2291_v4  ;;  %v2294_v15 = vpop.f32.mrb[14].mxu0 }
 0x197   : > { %v2295_v29 = vpop.f32.mrb[15].mxu0 }
 0x198   : > { %v2296_v16 = vadd.f32 %v2295_v29, %v2294_v15 }
 0x19c   : > { %v2325_v19 = vpop.f32.mrb[16].mxu0 }
 0x19d   : > { %v2326_v17 = vpop.f32.mrb[17].mxu0 }
 0x19e   : > { %v2327_v20 = vadd.f32 %v2326_v17, %v2325_v19  ;;  %v2328_v21 = vpop.f32.mrb[18].mxu0 }
 0x19f   : > { %v2329_v22 = vpop.f32.mrb[19].mxu0 }
 0x1a0   : > { %v2488_v23 = vadd.f32 %v2327_v20, %v2275_v60  ;;  %v2330_v25 = vadd.f32 %v2329_v22, %v2328_v21 }
 0x1a2   : > { %v2494_v26 = vadd.f32 %v2330_v25, %v2278_v1 }
 0x1a4   : > { %v2331_v0 = vpop.f32.mrb[20].mxu0 }
 0x1a5   : > { %v2332_v12 = vpop.f32.mrb[21].mxu0 }
 0x1a6   : > { %v2333_v40 = vadd.f32 %v2332_v12, %v2331_v0  ;;  %v2334_v27 = vpop.f32.mrb[22].mxu0 }
 0x1a7   : > { %v2335_v28 = vpop.f32.mrb[23].mxu0 }
 0x1a8   : > { %v2485_v30 = vadd.f32 %v2333_v40, %v2281_v24  ;;  %v2336_v31 = vadd.f32 %v2335_v28, %v2334_v27 }
 0x1aa   : > { %v2491_v32 = vadd.f32 %v2336_v31, %v2284_v7 }
 0x1ac   : > { %v2337_v33 = vpop.f32.mrb[24].mxu0 }
 0x1ad   : > { %v2338_v18 = vpop.f32.mrb[25].mxu0 }
 0x1ae   : > { %v2339_v35 = vadd.f32 %v2338_v18, %v2337_v33  ;;  %v2340_v34 = vpop.f32.mrb[26].mxu0 }
 0x1af   : > { %v2341_v38 = vpop.f32.mrb[27].mxu0 }
 0x1b0   : > { %v2500_v36 = vadd.f32 %v2339_v35, %v2287_v9  ;;  %v2342_v39 = vadd.f32 %v2341_v38, %v2340_v34 }
 0x1b2   : > { %v2506_v42 = vadd.f32 %v2342_v39, %v2290_v11 }
 0x1b4   : > { %v2343_v43 = vpop.f32.mrb[28].mxu0 }
 0x1b5   : > { %v2344_v44 = vpop.f32.mrb[29].mxu0 }
 0x1b6   : > { %v2345_v45 = vadd.f32 %v2344_v44, %v2343_v43  ;;  %v2346_v41 = vpop.f32.mrb[30].mxu0 }
 0x1b7   : > { %v2347_v37 = vpop.f32.mrb[31].mxu0 }
 0x1b8   : > { %v3330_v47 = vadd.f32 %v2345_v45, %v2293_v14  ;;  %v2348_v48 = vadd.f32 %v2347_v37, %v2346_v41 }
 0x1ba   : > { %v3332_v49 = vadd.f32 %v2348_v48, %v2296_v16 }
 0x1bc   : > { %v2377_v50 = vpop.f32.mrb[32].mxu0 }
 0x1bd   : > { %v2378_v51 = vpop.f32.mrb[33].mxu0 }
 0x1be   : > { %v2379_v46 = vadd.f32 %v2378_v51, %v2377_v50  ;;  %v2380_v52 = vpop.f32.mrb[34].mxu0 }
 0x1bf   : > { %v2381_v53 = vpop.f32.mrb[35].mxu0 }
 0x1c0   : > { %v2489_v54 = vadd.f32 %v2488_v23, %v2379_v46  ;;  %v2382_v55 = vadd.f32 %v2381_v53, %v2380_v52 }
 0x1c2   : > { %v2495_v58 = vadd.f32 %v2494_v26, %v2382_v55 }
 0x1c4   : > { %v2383_v1 = vpop.f32.mrb[36].mxu0 }
 0x1c5   : > { %v2479_v56 = vpop.f32.mrb[0].mxu1  ;;  %v2384_v3 = vpop.f32.mrb[37].mxu0 }
 0x1c6   : > { %v1747_v57 = vpop.f32.mrb[1].mxu1  ;;  %v2385_v24 = vadd.f32 %v2384_v3, %v2383_v1  ;;  %v2386_v5 = vpop.f32.mrb[38].mxu0 }
 0x1c7   : > { %v2490_v60 = vadd.f32 %v2489_v54, %v1747_v57  ;;  %v2480_v61 = vpop.f32.mrb[2].mxu1  ;;  %v2387_v9 = vpop.f32.mrb[39].mxu0 }
 0x1c8   : > { %v1750_v63 = vpop.f32.mrb[3].mxu1  ;;  %v2486_v10 = vadd.f32 %v2485_v30, %v2385_v24  ;;  %v2388_v62 = vadd.f32 %v2387_v9, %v2386_v5 }
 0x1c9   : > { %v2496_v2 = vadd.f32 %v2495_v58, %v1750_v63  ;;  %v1840_v6 = vmul.f32 %v2490_v60, %v2490_v60 }
 0x1ca   : > { %v2487_v13 = vadd.f32 %v2486_v10, %v2479_v56  ;;  %v2492_v15 = vadd.f32 %v2491_v32, %v2388_v62 }
 0x1cb   : > { %v2234_v7 = vpack.c.bf16 %v2496_v2, %v2490_v60  ;;  %v1826_v8 = vadd.f32 %v2496_v2, %v2490_v60  ;;  %v1841_v59 = vmul.f32 %v2496_v2, %v2496_v2 }
 0x1cc   : > { %v1842_v19 = vmul.f32 %v2487_v13, %v2487_v13  ;;  %v2493_v17 = vadd.f32 %v2492_v15, %v2480_v61  ;;  %v2389_v21 = vpop.f32.mrb[40].mxu0 }
 0x1cd   : > { %2235 = vst [vmem:[%s3336_s24] sm:$0xff] %v2234_v7   ;;  %v1848_v11 = vadd.f32 %v1841_v59, %v1840_v6  ;;  %v2483_v4 = vpop.f32.mrb[4].mxu1  ;;  %v1827_v16 = vadd.f32 %v2487_v13, %v1826_v8  ;;  %v2390_v22 = vpop.f32.mrb[41].mxu0 }
 0x1ce   : > { %v1763_v14 = vpop.f32.mrb[5].mxu1  ;;  %v2239_v25 = vpack.c.bf16 %v2493_v17, %v2487_v13  ;;  %v1843_v0 = vmul.f32 %v2493_v17, %v2493_v17  ;;  %v2392_v12 = vpop.f32.mrb[42].mxu0  ;;  %v2391_v40 = vadd.f32 %v2390_v22, %v2389_v21 }
 0x1cf   : > { %v2484_v29 = vpop.f32.mrb[6].mxu1  ;;  %v1849_v23 = vadd.f32 %v1848_v11, %v1842_v19  ;;  %v1828_v26 = vadd.f32 %v2493_v17, %v1827_v16  ;;  %v2393_v27 = vpop.f32.mrb[43].mxu0 }
 0x1d0   : > { %v1766_v20 = vpop.f32.mrb[7].mxu1  ;;  %2254 = vst [vmem:[%s3336_s24 + $0x8] sm:$0xff] %v2239_v25   ;;  %v2394_v30 = vadd.f32 %v2393_v27, %v2392_v12  ;;  %v2501_v31 = vadd.f32 %v2500_v36, %v2391_v40 }
 0x1d1   : > { %v1850_v28 = vadd.f32 %v1849_v23, %v1843_v0 }
 0x1d2   : > { %v2507_v32 = vadd.f32 %v2506_v42, %v2394_v30  ;;  %v2502_v33 = vadd.f32 %v2501_v31, %v1763_v14 }
 0x1d4   : > { %v2508_v18 = vadd.f32 %v2507_v32, %v1766_v20  ;;  %v2395_v35 = vpop.f32.mrb[44].mxu0  ;;  %v1829_v34 = vadd.f32 %v2502_v33, %v1828_v26  ;;  %v1844_v38 = vmul.f32 %v2502_v33, %v2502_v33 }
 0x1d5   : > { %v2396_v39 = vpop.f32.mrb[45].mxu0 }
 0x1d6   : > { %v2244_v43 = vpack.c.bf16 %v2508_v18, %v2502_v33  ;;  %v1845_v44 = vmul.f32 %v2508_v18, %v2508_v18  ;;  %v2397_v45 = vadd.f32 %v2396_v39, %v2395_v35  ;;  %v2398_v41 = vpop.f32.mrb[46].mxu0  ;;  %v1851_v37 = vadd.f32 %v1850_v28, %v1844_v38 }
 0x1d7   : > { %v1830_v48 = vadd.f32 %v2508_v18, %v1829_v34  ;;  %v2399_v50 = vpop.f32.mrb[47].mxu0 }
 0x1d8   : > { %2255 = vst [vmem:[%s3336_s24 + $0x10] sm:$0xff] %v2244_v43   ;;  %v2498_v51 = vadd.f32 %v3330_v47, %v2397_v45  ;;  %v2400_v36 = vadd.f32 %v2399_v50, %v2398_v41  ;;  %v1852_v42 = vadd.f32 %v1851_v37, %v1845_v44 }
 0x1da   : > { %v2499_v46 = vadd.f32 %v2498_v51, %v2483_v4  ;;  %v2504_v52 = vadd.f32 %v3332_v49, %v2400_v36 }
 0x1dc   : > { %v1831_v53 = vadd.f32 %v2499_v46, %v1830_v48  ;;  %v1846_v54 = vmul.f32 %v2499_v46, %v2499_v46  ;;  %v2505_v55 = vadd.f32 %v2504_v52, %v2484_v29 }
 0x1de   : > { %v1853_v47 = vadd.f32 %v1852_v42, %v1846_v54  ;;  %v2249_v56 = vpack.c.bf16 %v2505_v55, %v2499_v46  ;;  %v1832_v57 = vadd.f32 %v2505_v55, %v1831_v53  ;;  %v1847_v58 = vmul.f32 %v2505_v55, %v2505_v55 }
 0x1e0   : > { %2256 = vst [vmem:[%s3336_s24 + $0x18] sm:$0xff] %v2249_v56   ;;  %v1833_v49 = vrot.slane %v1832_v57, 4  ;;  %v1854_v60 = vadd.f32 %v1853_v47, %v1847_v58 }
 0x1e1   : > { %2832 = shalt.err (!%p2829_p13)
}
 0x1e2   : > { %s2833_s7 = scalar_lea.hbm %s3350_s30, 512  ;;  %s2837_s15 = scalar_lea.hbm %s3430_s4, 1024 }
 0x1e3   : > { %p2834_p0 = scmp.ne.s32.totalorder %s3350_s30, %s2833_s7  ;;  %p2838_p9 = scmp.lt.u32.totalorder %s3350_s30, %s3430_s4 }
 0x1e4   : > { %p2839_p12 = scmp.lt.u32.totalorder %s2837_s15, %s2833_s7  ;;  %p2841_p1 = scmp.lt.u32.totalorder %s2833_s7, %s3350_s30 }
 0x1e5   : > { %p2835_p5 = pnand %p2834_p0, %p3114_p6 }
 0x1e6   : > { %p2840_p2 = por %p2839_p12, %p2838_p9 }
 0x1e7   : > { %p2836_p11 = pneg %p2835_p5 }
 0x1e8   : > { %p2842_p4 = por %p2841_p1, %p2840_p2 }
 0x1ea   : > { %p2843_p8 = pnand %p2842_p4, %p2836_p11 }
 0x1ec   : > { %2846 = shalt.err (!%p2843_p8)
}
 0x1ed   : > { %s2935_s14 = smov 64   ;;  %s2936_s11 = smov 4   ;;  %v1834_v61 = vadd.f32 %v1833_v49, %v1832_v57  ;;  %v1855_v63 = vrot.slane %v1854_v60, 4 }
 0x1ee   : > { %2539 = dma.vmem_to_hbm [thread:$0]  (%p3114_p6), %s3345_s26, 512, %s3350_s30, %s1863_s28, %s2935_s14, %s2935_s14, %s2936_s11  }
 0x1ef   : > { %s2043_s10 = sshll.u32 %s3165_s17, 1  ;;  %v1835_v1 = vrot.slane %v1834_v61, 2  ;;  %v1856_v2 = vadd.f32 %v1855_v63, %v1854_v60  ;;  %s2194_s29 = sshll.u32 %s2989_s22, 5 }
 0x1f0   : > { %s293_s12 = scalar_lea.vmem [#allocation12], %s2043_s10  ;;  %s3382_s30 = scalar_lea.hbm %s3431_s5, %s2194_s29 }
 0x1f1   : > { %v1836_v3 = vadd.f32 %v1835_v1, %v1834_v61  ;;  %v1857_v24 = vrot.slane %v1856_v2, 2  ;;  %s1897_s23 = sshll.u32 %s293_s12, 4  ;;  %s1868_s28 = scalar_lea.sflag [#allocation13], %s3165_s17  ;;  %s3384_s23 = int_to_ptr.vmem [resolvable:$true] %s1897_s23 }
 0x1f2   : > { %s2847_s8 = scalar_lea.vmem %s3384_s23, 32  ;;  %s2937_s22 = smov [#allocation12]  }
 0x1f3   : > { %v1837_v5 = vrot.slane %v1836_v3, 1  ;;  %v1858_v6 = vadd.f32 %v1857_v24, %v1856_v2  ;;  %p2848_p3 = scmp.ne.s32.totalorder %s3384_s23, %s2847_s8  ;;  %s2851_s9 = sshll.u32 %s2937_s22, 4  ;;  %s2852_s9 = int_to_ptr.vmem [resolvable:$false] %s2851_s9 }
 0x1f4   : > { %s2853_s15 = scalar_lea.vmem %s2852_s9, 64  ;;  %p2854_p13 = scmp.lt.s32.totalorder %s3384_s23, %s2852_s9 }
 0x1f5   : > { %v1838_v7 = vadd.f32 %v1837_v5, %v1836_v3  ;;  %v1859_v8 = vrot.slane %v1858_v6, 1  ;;  %p2849_p7 = pnand %p2848_p3, %p3114_p6  ;;  %p2855_p0 = scmp.lt.s32.totalorder %s2853_s15, %s2847_s8 }
 0x1f7   : > { %1839 = vst [vmem:[%s293_s12] sm:$0x1] %v1838_v7  ;;  %v1860_v59 = vadd.f32 %v1859_v8, %v1858_v6  ;;  %p2850_p10 = pneg %p2849_p7  ;;  %p2856_p5 = por %p2855_p0, %p2854_p13 }
 0x1f9   : > { %1861 = vst [vmem:[%s293_s12 + $0x1] sm:$0x1] %v1860_v59  ;;  %p2857_p11 = pnand %p2856_p5, %p2850_p10 }
 0x1fb   : > { %2860 = shalt.err (!%p2857_p11)
}
 0x1fc   : > { %s2861_s17 = scalar_lea.hbm %s3382_s30, 32  ;;  %s2865_s14 = scalar_lea.hbm %s3431_s5, 64 }
 0x1fd   : > { %p2862_p9 = scmp.ne.s32.totalorder %s3382_s30, %s2861_s17  ;;  %p2866_p1 = scmp.lt.u32.totalorder %s3382_s30, %s3431_s5 }
 0x1fe   : > { %p2867_p4 = scmp.lt.u32.totalorder %s2865_s14, %s2861_s17  ;;  %p2869_p3 = scmp.lt.u32.totalorder %s2861_s17, %s3382_s30 }
 0x1ff   : > { %p2863_p12 = pnand %p2862_p9, %p3114_p6 }
 0x200   : > { %p2868_p8 = por %p2867_p4, %p2866_p1 }
 0x201   : > { %p2864_p2 = pneg %p2863_p12 }
 0x202   : > { %p2870_p7 = por %p2869_p3, %p2868_p8 }
 0x204   : > { %p2871_p10 = pnand %p2870_p7, %p2864_p2 }
 0x206   : > { %2874 = shalt.err (!%p2871_p10)
}
 0x207   : > { %2540 = dma.vmem_to_hbm [thread:$0]  (%p3114_p6), %s3384_s23, 32, %s3382_s30, %s1868_s28  }
 0x208 PF: > { %s1909_s29 = sand.u32 1, %s2913_s18   ;;  %p3453_p13 = scmp.ne.s32.totalorder %s3436_s25, 0 }
 0x209   : > { %p3454_p0 = scmp.ge.s32.totalorder %s2925_s21, 2  ;;  %s1910_s12 = scalar_lea.sflag [#allocation5], %s1909_s29 }
 0x20b   : > { %p2558_p5 = pnand %p3454_p0, %p3453_p13 }
 0x20d   : > { %2904 = dma.done.wait (!%p2558_p5), %s1910_s12, 512  }
 0x20e   : > { %2906 = vsyncadd (!%p2558_p5), %s1910_s12, 4294966784  ;;  %s1919_s7 = scalar_lea.sflag [#allocation13], %s1909_s29 }
 0x20f   : > { %2908 = dma.done.wait (!%p2558_p5), %s1919_s7, 32  }
 0x210   : > { %2910 = vsyncadd (!%p2558_p5), %s1919_s7, 4294967264  ;;  %p24_p6 = scmp.ge.s32.totalorder %s3100_s16, 4   ;;  %s3455_s18 = smov %s2917_s19 }
 0x211   : > { %s3456_s19 = smov %s2921_s20  ;;  %s3457_s20 = smov %s3110_s27 }
 0x212   : > { %s3458_s21 = smov %s3100_s16  ;;  %26 = sbr.rel (!%p24_p6) target bundleno = 9 (0x9), region = 115 }
 0x219   :  { %1924 = vsyncpa [#allocation4], 1 }
 0x21a   :  { %1926 = vsyncpa [#allocation4 + $0x1], 1 }
 0x21b   :  { %1927 = vsyncpa [#allocation7], 1 }
 0x21c   :  { %1928 = vsyncpa [#allocation10], 1 }
 0x21d   :  { %1929 = vsyncpa [#allocation5], 1 }
 0x21e   :  { %1931 = vsyncpa [#allocation5 + $0x1], 1 }
 0x21f   :  { %1932 = vsyncpa [#allocation13], 1 }
 0x220   :  { %1934 = vsyncpa [#allocation13 + $0x1], 1 }

</bundles_post_ra>
